<compile_context>
chip_gen: v6e
topology: v6e:2x2x1
jax: 0.10.0
libtpu: 0.0.40
codegen_flags: <defaults>
</compile_context>

<pallas_src>
import functools
import math

import jax
import jax.numpy as jnp
from jax.experimental import pallas as pl
from jax.experimental.pallas import tpu as pltpu


def _ceil_to(v, m):
    return -(-v // m) * m


# ----------------------------------------------------------------------------
# Kernel 1 (one per GNN layer): fused GCN + ReLU + HGPSL node score.
#   h     = relu( D^-1/2 (A+I) D^-1/2 X W )
#   score = || h - D^-1 A h ||_1   per node   (lane-dense (1, N) output)
# ----------------------------------------------------------------------------
def _gcn_score_kernel(a_ref, x_ref, w_ref, h_ref, s_ref, *, n_valid):
    a = a_ref[0]                                    # (N, N) bf16, exactly 0/1
    x = x_ref[0]                                    # (N, Fin) f32
    n = a.shape[0]

    deg = jnp.sum(a.astype(jnp.float32), axis=1, keepdims=True)   # rowsum(A), (N,1)

    # --- GCN + ReLU:  r ⊙ (A (r⊙XW) + r⊙XW),  r = rsqrt(deg+1) ------------
    r = jax.lax.rsqrt(deg + 1.0)
    xw = jnp.dot(x, w_ref[...], preferred_element_type=jnp.float32)  # (N, Fout)
    y = r * xw
    ay = jnp.dot(a, y.astype(a.dtype), preferred_element_type=jnp.float32)
    h = jnp.maximum(r * (ay + y), 0.0)                                # relu(gcn(x))
    h_ref[0] = h

    # --- node information score:  sum_f | h - (A h) / max(deg,1) | --------
    prop = jnp.dot(a, h.astype(a.dtype),
                   preferred_element_type=jnp.float32) / jnp.maximum(deg, 1.0)
    diff = jnp.abs(h - prop)                                          # (N, Fout)
    # lane-dense (1, N) score via ones @ diff^T (transpose folds into the MXU)
    ones_f = jnp.ones((1, diff.shape[1]), jnp.float32)
    score = jnp.dot(ones_f, diff.T, preferred_element_type=jnp.float32)  # (1, N)
    col = jax.lax.broadcasted_iota(jnp.int32, (1, n), 1)
    s_ref[0] = jnp.where(col < n_valid, score, jnp.float32(-1e30))


def gcn_score(adj, x, w, n_valid):
    """Fused GCN+ReLU+pool-score. adj: (B,N,N) bf16, x: (B,N,Fin) f32."""
    B, N, _ = adj.shape
    Fin = x.shape[-1]
    Fout = w.shape[-1]
    h, s = pl.pallas_call(
        functools.partial(_gcn_score_kernel, n_valid=n_valid),
        out_shape=(jax.ShapeDtypeStruct((B, N, Fout), jnp.float32),
                   jax.ShapeDtypeStruct((B, 1, N), jnp.float32)),
        grid=(B,),
        in_specs=[
            pl.BlockSpec((1, N, N), lambda b: (b, 0, 0)),
            pl.BlockSpec((1, N, Fin), lambda b: (b, 0, 0)),
            pl.BlockSpec((Fin, Fout), lambda b: (0, 0)),
        ],
        out_specs=(
            pl.BlockSpec((1, N, Fout), lambda b: (b, 0, 0)),
            pl.BlockSpec((1, 1, N), lambda b: (b, 0, 0)),
        ),
        compiler_params=pltpu.CompilerParams(dimension_semantics=("parallel",)),
    )(adj, x, w)
    return h, s[:, 0, :]                              # h: (B,N,Fout), score: (B,N)


# ----------------------------------------------------------------------------
# Kernel 2 (head): gmp/gap pools + relu/add/concat + lin1 + ReLU + BN + lin3.
#   concat([xf, x3]) @ W1 is split as xf @ W1[:d] + x3 @ W1[d:]; the inner
#   concat of [gmp|gap] is split the same way (exactly equivalent).
# ----------------------------------------------------------------------------
def _head_kernel(h1_ref, h2_ref, xf_ref, w1a_ref, w1bm_ref, w1bg_ref,
                 b1_ref, gamma_ref, beta_ref, w3_ref, b3_ref, o_ref,
                 *, n1, n2):
    h1 = h1_ref[...]                                  # (B, N1p, F), rows >= n1 are 0
    h2 = h2_ref[...]                                  # (B, N2p, F), rows >= n2 are 0

    # global max / mean pools; features are post-ReLU (>= 0) so zero padding
    # never changes the max and contributes 0 to the sum.
    gmp1 = jnp.max(h1, axis=1)                        # (B, F)
    gap1 = jnp.sum(h1, axis=1) * (1.0 / n1)
    gmp2 = jnp.max(h2, axis=1)
    gap2 = jnp.sum(h2, axis=1) * (1.0 / n2)

    x3m = jnp.maximum(gmp1, 0.0) + jnp.maximum(gmp2, 0.0)   # relu(x1)+relu(x2), gmp half
    x3g = jnp.maximum(gap1, 0.0) + jnp.maximum(gap2, 0.0)   # gap half
    xf = jnp.maximum(xf_ref[...], 0.0)                       # F.relu(x.view(B, -1))

    h = (jnp.dot(xf, w1a_ref[...], preferred_element_type=jnp.float32)
         + jnp.dot(x3m, w1bm_ref[...], preferred_element_type=jnp.float32)
         + jnp.dot(x3g, w1bg_ref[...], preferred_element_type=jnp.float32)
         + b1_ref[...])
    h = jnp.maximum(h, 0.0)                                  # F.relu(lin1(x))

    # BatchNorm1d, training-mode batch statistics (biased var, eps=1e-5).
    mean = jnp.mean(h, axis=0, keepdims=True)
    var = jnp.mean((h - mean) ** 2, axis=0, keepdims=True)
    hn = (h - mean) * jax.lax.rsqrt(var + 1e-5) * gamma_ref[...] + beta_ref[...]

    o_ref[...] = jnp.dot(hn, w3_ref[...], preferred_element_type=jnp.float32) + b3_ref[...]


def _full_spec(arr):
    nd = arr.ndim
    return pl.BlockSpec(arr.shape, lambda *_: (0,) * nd)


def head(h1, h2, xf, params, n1, n2):
    B, _, dim2 = h2.shape
    nhid = params["b1"].shape[0]
    d_real = n2 * dim2                                # = dim3 * out_dim2
    w1 = params["w1"]
    w1a = jnp.pad(w1[:d_real], ((0, xf.shape[1] - d_real), (0, 0)))  # zero-pad K
    w1bm = w1[d_real:d_real + dim2]                   # gmp part of concat([gmp,gap])
    w1bg = w1[d_real + dim2:d_real + 2 * dim2]        # gap part
    args = (
        h1, h2, xf, w1a, w1bm, w1bg,
        params["b1"].reshape(1, nhid),
        params["gamma"].reshape(1, nhid),
        params["beta"].reshape(1, nhid),
        params["w3"],
        params["b3"].reshape(1, 1),
    )
    out = pl.pallas_call(
        functools.partial(_head_kernel, n1=n1, n2=n2),
        out_shape=jax.ShapeDtypeStruct((B, 1), jnp.float32),
        grid=(1,),
        in_specs=[_full_spec(a) for a in args],
        out_specs=pl.BlockSpec((B, 1), lambda i: (0, 0)),
        compiler_params=pltpu.CompilerParams(dimension_semantics=("arbitrary",)),
    )(*args)
    return out.reshape(B)                             # torch.flatten(lin3(...))


# ----------------------------------------------------------------------------
# Glue: top-k node selection (HGPSLPool keep, sl=False -> induced subgraph),
# zero-padded to a tile-friendly node count.
# ----------------------------------------------------------------------------
def topk_select_pad(h, a, score, k, k_pad):
    _, idx = jax.lax.top_k(score, k)                            # (B,k) desc, like PyG
    h_k = jnp.take_along_axis(h, idx[:, :, None], axis=1)       # (B,k,F)
    a_k = jnp.take_along_axis(a, idx[:, :, None], axis=1)       # (B,k,N)
    a_k = jnp.take_along_axis(a_k, idx[:, None, :], axis=2)     # (B,k,k)
    pad = k_pad - k
    if pad:
        h_k = jnp.pad(h_k, ((0, 0), (0, pad), (0, 0)))
        a_k = jnp.pad(a_k, ((0, 0), (0, pad), (0, pad)))
    return h_k, a_k


# ----------------------------------------------------------------------------
# Full forward (mirrors Mybraingnn.forward)
# ----------------------------------------------------------------------------
def mybraingnn_forward(x, adj, params, pooling_ratio):
    B, N0, _ = x.shape
    dim2 = params["w_gcn1"].shape[1]
    n1 = math.ceil(pooling_ratio * N0)                # kept nodes after pool1
    n2 = math.ceil(pooling_ratio * n1)                # kept nodes after pool2 (= dim3)

    # tile-friendly padded node counts (zero rows/cols -> exact results)
    N0p = _ceil_to(N0, 128)                           # 111 -> 128
    n1p = _ceil_to(n1, 16)                            # 56  -> 64
    n2p = _ceil_to(n2, 16)                            # 28  -> 32

    adj_p = jnp.pad(adj.astype(jnp.bfloat16),
                    ((0, 0), (0, N0p - N0), (0, N0p - N0)))       # bf16 is exact for 0/1
    x_p = jnp.pad(x, ((0, 0), (0, N0p - N0), (0, 0)))

    # layer 1: relu(gcn1) + pool1 score (single fused pallas_call)
    h1, s1 = gcn_score(adj_p, x_p, params["w_gcn1"], n_valid=N0)
    h1k, a1k = topk_select_pad(h1, adj_p, s1, n1, n1p)            # pool1 keep (+pad)
    # layer 2: relu(gcn2) + pool2 score
    h2, s2 = gcn_score(a1k, h1k, params["w_gcn2"], n_valid=n1)
    _, idx2 = jax.lax.top_k(s2, n2)                               # pool2 keep
    h2k = jnp.take_along_axis(h2, idx2[:, :, None], axis=1)       # (B, n2, dim2)
    h2k = jnp.pad(h2k, ((0, 0), (0, n2p - n2), (0, 0)))

    # head: gmp/gap + relu/cat + lin1 + ReLU + BN + lin3, all in one kernel
    xf = h2k.reshape(B, n2p * dim2)                   # x.view(B, dim3*out_dim2) + zero tail
    return head(h1k, h2k, xf, params, n1, n2)         # (B,)


# ----------------------------------------------------------------------------
# Deterministic parameter / input construction
# ----------------------------------------------------------------------------
def make_params(key, dim1, dim2, nhid, pooling_ratio):
    dim3 = math.ceil(pooling_ratio * math.ceil(pooling_ratio * 111))
    dim4 = (dim3 + 2) * dim2
    ks = jax.random.split(key, 6)
    params = {
        "w_gcn1": 0.2 * jax.random.normal(ks[0], (dim1, dim2), jnp.float32),
        "w_gcn2": 0.2 * jax.random.normal(ks[1], (dim2, dim2), jnp.float32),
        "w1": 0.1 * jax.random.normal(ks[2], (dim4, nhid), jnp.float32),
        "b1": 0.1 * jax.random.normal(ks[3], (nhid,), jnp.float32),
        "gamma": jnp.ones((nhid,), jnp.float32),
        "beta": jnp.zeros((nhid,), jnp.float32),
        "w3": 0.1 * jax.random.normal(ks[4], (nhid, 1), jnp.float32),
        "b3": 0.1 * jax.random.normal(ks[5], (1,), jnp.float32),
    }
    # NOTE: lin2 and dropout_ratio are defined in __init__ but unused in forward.
    return params


if __name__ == "__main__":
    B = 2
    N0 = 111            # implied by dim3 = ceil(r * ceil(r * 111))
    dim1 = 8            # input node-feature dim
    dim2 = 8            # gcn output dim
    nhid = 16
    pooling_ratio = 0.5

    key = jax.random.PRNGKey(0)
    k_x, k_a, k_p = jax.random.split(key, 3)

    x = jax.random.normal(k_x, (B, N0, dim1), jnp.float32)
    u = jax.random.uniform(k_a, (B, N0, N0))
    adj = (u < 0.08).astype(jnp.float32)
    adj = jnp.maximum(adj, jnp.transpose(adj, (0, 2, 1)))         # symmetrize
    adj = adj * (1.0 - jnp.eye(N0, dtype=jnp.float32))            # no self loops

    params = make_params(k_p, dim1, dim2, nhid, pooling_ratio)

    fwd = jax.jit(mybraingnn_forward, static_argnums=(3,))
    out = fwd(x, adj, params, pooling_ratio)
    out = jax.block_until_ready(out)
    assert out.shape == (B,)
    print("KERNEL_OK")
</pallas_src>

<mosaic_0001>
module attributes {stable_mosaic.version = 11 : i64} {
  func.func @_gcn_score_kernel(%arg0: i32, %arg1: memref<1x128x128xbf16, #tpu.memory_space<vmem>>, %arg2: memref<1x128x8xf32, #tpu.memory_space<vmem>>, %arg3: memref<8x8xf32, #tpu.memory_space<vmem>>, %arg4: memref<1x128x8xf32, #tpu.memory_space<vmem>>, %arg5: memref<1x1x128xf32, #tpu.memory_space<vmem>>) attributes {dimension_semantics = [#tpu.dimension_semantics<parallel>], iteration_bounds = array<i64: 2>, scalar_prefetch = 0 : i64, scratch_operands = 0 : i64, tpu.core_type = #tpu.core_type<tc>, window_params = [{transform_indices = @transform_0, window_bounds = array<i64: 1, 128, 128>}, {transform_indices = @transform_1, window_bounds = array<i64: 1, 128, 8>}, {pipeline_mode = #tpu.pipeline_mode<synchronous>, transform_indices = @transform_2, window_bounds = array<i64: 8, 8>}, {transform_indices = @transform_3, window_bounds = array<i64: 1, 128, 8>}, {transform_indices = @transform_4, window_bounds = array<i64: 1, 1, 128>}]} {
    %c0 = arith.constant 0 : index
    %c0_0 = arith.constant 0 : index
    %c0_1 = arith.constant 0 : index
    %0 = vector.load %arg1[%c0, %c0_0, %c0_1] : memref<1x128x128xbf16, #tpu.memory_space<vmem>>, vector<1x128x128xbf16>
    %1 = vector.shape_cast %0 : vector<1x128x128xbf16> to vector<128x128xbf16>
    %c0_2 = arith.constant 0 : index
    %c0_3 = arith.constant 0 : index
    %c0_4 = arith.constant 0 : index
    %2 = vector.load %arg2[%c0_2, %c0_3, %c0_4] : memref<1x128x8xf32, #tpu.memory_space<vmem>>, vector<1x128x8xf32>
    %3 = vector.shape_cast %2 : vector<1x128x8xf32> to vector<128x8xf32>
    %4 = arith.extf %1 : vector<128x128xbf16> to vector<128x128xf32>
    %cst = arith.constant dense<0.000000e+00> : vector<128xf32>
    %5 = vector.multi_reduction <add>, %4, %cst [1] : vector<128x128xf32> to vector<128xf32>
    %6 = vector.shape_cast %5 : vector<128xf32> to vector<128x1xf32>
    %cst_5 = arith.constant 1.000000e+00 : f32
    %7 = vector.broadcast %cst_5 : f32 to vector<128x1xf32>
    %8 = arith.addf %6, %7 : vector<128x1xf32>
    %9 = math.rsqrt %8 : vector<128x1xf32>
    %c0_6 = arith.constant 0 : index
    %c0_7 = arith.constant 0 : index
    %10 = vector.load %arg3[%c0_6, %c0_7] : memref<8x8xf32, #tpu.memory_space<vmem>>, vector<8x8xf32>
    %cst_8 = arith.constant dense<0.000000e+00> : vector<128x8xf32>
    %11 = tpu.matmul %3, %10, %cst_8 {dimension_numbers = #tpu.dot_dimension_numbers<[1], [0], [0], [1], [0, 0, 1, 1], [], []>} : vector<128x8xf32>, vector<8x8xf32>, vector<128x8xf32> -> vector<128x8xf32>
    %12 = vector.broadcast %9 : vector<128x1xf32> to vector<128x8xf32>
    %13 = arith.mulf %12, %11 : vector<128x8xf32>
    %14 = arith.truncf %13 : vector<128x8xf32> to vector<128x8xbf16>
    %cst_9 = arith.constant dense<0.000000e+00> : vector<128x8xf32>
    %15 = tpu.matmul %1, %14, %cst_9 {dimension_numbers = #tpu.dot_dimension_numbers<[1], [0], [0], [1], [0, 0, 1, 1], [], []>} : vector<128x128xbf16>, vector<128x8xbf16>, vector<128x8xf32> -> vector<128x8xf32>
    %16 = arith.addf %15, %13 : vector<128x8xf32>
    %17 = vector.broadcast %9 : vector<128x1xf32> to vector<128x8xf32>
    %18 = arith.mulf %17, %16 : vector<128x8xf32>
    %cst_10 = arith.constant 0.000000e+00 : f32
    %19 = vector.broadcast %cst_10 : f32 to vector<128x8xf32>
    %20 = arith.maximumf %18, %19 : vector<128x8xf32>
    %c0_11 = arith.constant 0 : index
    %c0_12 = arith.constant 0 : index
    %c0_13 = arith.constant 0 : index
    %21 = vector.load %arg4[%c0_11, %c0_12, %c0_13] : memref<1x128x8xf32, #tpu.memory_space<vmem>>, vector<1x128x8xf32>
    %22 = vector.shape_cast %21 : vector<1x128x8xf32> to vector<128x8xf32>
    %23 = vector.shape_cast %20 : vector<128x8xf32> to vector<1x128x8xf32>
    tpu.vector_store %arg4[%c0_11, %c0_12, %c0_13], %23 {strides = array<i32>} : memref<1x128x8xf32, #tpu.memory_space<vmem>>, vector<1x128x8xf32>,
    %24 = arith.truncf %20 : vector<128x8xf32> to vector<128x8xbf16>
    %cst_14 = arith.constant dense<0.000000e+00> : vector<128x8xf32>
    %25 = tpu.matmul %1, %24, %cst_14 {dimension_numbers = #tpu.dot_dimension_numbers<[1], [0], [0], [1], [0, 0, 1, 1], [], []>} : vector<128x128xbf16>, vector<128x8xbf16>, vector<128x8xf32> -> vector<128x8xf32>
    %cst_15 = arith.constant 1.000000e+00 : f32
    %26 = vector.broadcast %cst_15 : f32 to vector<128x1xf32>
    %27 = arith.maximumf %6, %26 : vector<128x1xf32>
    %28 = vector.broadcast %27 : vector<128x1xf32> to vector<128x8xf32>
    %29 = arith.divf %25, %28 : vector<128x8xf32>
    %30 = arith.subf %20, %29 : vector<128x8xf32>
    %31 = math.absf %30 : vector<128x8xf32>
    %cst_16 = arith.constant 1.000000e+00 : f32
    %32 = vector.broadcast %cst_16 : f32 to vector<1x8xf32>
    %33 = tpu.transpose %31, [1, 0] : vector<128x8xf32> -> vector<8x128xf32>
    %cst_17 = arith.constant dense<0.000000e+00> : vector<1x128xf32>
    %34 = tpu.matmul %32, %33, %cst_17 {dimension_numbers = #tpu.dot_dimension_numbers<[1], [0], [0], [1], [0, 0, 1, 1], [], []>} : vector<1x8xf32>, vector<8x128xf32>, vector<1x128xf32> -> vector<1x128xf32>
    %35 = tpu.iota {dimensions = array<i32: 1>} : vector<1x128xi32>
    %c111_i32 = arith.constant 111 : i32
    %36 = vector.broadcast %c111_i32 : i32 to vector<1x128xi32>
    %37 = arith.cmpi slt, %35, %36 : vector<1x128xi32>
    %cst_18 = arith.constant -1.000000e+30 : f32
    %38 = vector.broadcast %cst_18 : f32 to vector<1x128xf32>
    %39 = arith.select %37, %34, %38 : vector<1x128xi1>, vector<1x128xf32>
    %c0_19 = arith.constant 0 : index
    %c0_20 = arith.constant 0 : index
    %c0_21 = arith.constant 0 : index
    %40 = vector.load %arg5[%c0_19, %c0_20, %c0_21] : memref<1x1x128xf32, #tpu.memory_space<vmem>>, vector<1x1x128xf32>
    %41 = vector.shape_cast %40 : vector<1x1x128xf32> to vector<1x128xf32>
    %42 = vector.shape_cast %39 : vector<1x128xf32> to vector<1x1x128xf32>
    tpu.vector_store %arg5[%c0_19, %c0_20, %c0_21], %42 {strides = array<i32>} : memref<1x1x128xf32, #tpu.memory_space<vmem>>, vector<1x1x128xf32>,
    return
  }
  func.func @transform_0(%arg0: i32) -> (i32, i32, i32) {
    %c0_i32 = arith.constant 0 : i32
    %c0_i32_0 = arith.constant 0 : i32
    %c0_i32_1 = arith.constant 0 : i32
    return %arg0, %c0_i32, %c0_i32_0 : i32, i32, i32
  }
  func.func @transform_1(%arg0: i32) -> (i32, i32, i32) {
    %c0_i32 = arith.constant 0 : i32
    %c0_i32_0 = arith.constant 0 : i32
    %c0_i32_1 = arith.constant 0 : i32
    return %arg0, %c0_i32, %c0_i32_0 : i32, i32, i32
  }
  func.func @transform_2(%arg0: i32) -> (i32, i32) {
    %c0_i32 = arith.constant 0 : i32
    %c0_i32_0 = arith.constant 0 : i32
    %c0_i32_1 = arith.constant 0 : i32
    return %c0_i32, %c0_i32_0 : i32, i32
  }
  func.func @transform_3(%arg0: i32) -> (i32, i32, i32) {
    %c0_i32 = arith.constant 0 : i32
    %c0_i32_0 = arith.constant 0 : i32
    %c0_i32_1 = arith.constant 0 : i32
    return %arg0, %c0_i32, %c0_i32_0 : i32, i32, i32
  }
  func.func @transform_4(%arg0: i32) -> (i32, i32, i32) {
    %c0_i32 = arith.constant 0 : i32
    %c0_i32_0 = arith.constant 0 : i32
    %c0_i32_1 = arith.constant 0 : i32
    return %arg0, %c0_i32, %c0_i32_0 : i32, i32, i32
  }
}

module attributes {stable_mosaic.version = 11 : i64} {
  func.func @_gcn_score_kernel(%arg0: i32, %arg1: memref<1x64x64xbf16, #tpu.memory_space<vmem>>, %arg2: memref<1x64x8xf32, #tpu.memory_space<vmem>>, %arg3: memref<8x8xf32, #tpu.memory_space<vmem>>, %arg4: memref<1x64x8xf32, #tpu.memory_space<vmem>>, %arg5: memref<1x1x64xf32, #tpu.memory_space<vmem>>) attributes {dimension_semantics = [#tpu.dimension_semantics<parallel>], iteration_bounds = array<i64: 2>, scalar_prefetch = 0 : i64, scratch_operands = 0 : i64, tpu.core_type = #tpu.core_type<tc>, window_params = [{transform_indices = @transform_0, window_bounds = array<i64: 1, 64, 64>}, {transform_indices = @transform_1, window_bounds = array<i64: 1, 64, 8>}, {pipeline_mode = #tpu.pipeline_mode<synchronous>, transform_indices = @transform_2, window_bounds = array<i64: 8, 8>}, {transform_indices = @transform_3, window_bounds = array<i64: 1, 64, 8>}, {transform_indices = @transform_4, window_bounds = array<i64: 1, 1, 64>}]} {
    %c0 = arith.constant 0 : index
    %c0_0 = arith.constant 0 : index
    %c0_1 = arith.constant 0 : index
    %0 = vector.load %arg1[%c0, %c0_0, %c0_1] : memref<1x64x64xbf16, #tpu.memory_space<vmem>>, vector<1x64x64xbf16>
    %1 = vector.shape_cast %0 : vector<1x64x64xbf16> to vector<64x64xbf16>
    %c0_2 = arith.constant 0 : index
    %c0_3 = arith.constant 0 : index
    %c0_4 = arith.constant 0 : index
    %2 = vector.load %arg2[%c0_2, %c0_3, %c0_4] : memref<1x64x8xf32, #tpu.memory_space<vmem>>, vector<1x64x8xf32>
    %3 = vector.shape_cast %2 : vector<1x64x8xf32> to vector<64x8xf32>
    %4 = arith.extf %1 : vector<64x64xbf16> to vector<64x64xf32>
    %cst = arith.constant dense<0.000000e+00> : vector<64xf32>
    %5 = vector.multi_reduction <add>, %4, %cst [1] : vector<64x64xf32> to vector<64xf32>
    %6 = vector.shape_cast %5 : vector<64xf32> to vector<64x1xf32>
    %cst_5 = arith.constant 1.000000e+00 : f32
    %7 = vector.broadcast %cst_5 : f32 to vector<64x1xf32>
    %8 = arith.addf %6, %7 : vector<64x1xf32>
    %9 = math.rsqrt %8 : vector<64x1xf32>
    %c0_6 = arith.constant 0 : index
    %c0_7 = arith.constant 0 : index
    %10 = vector.load %arg3[%c0_6, %c0_7] : memref<8x8xf32, #tpu.memory_space<vmem>>, vector<8x8xf32>
    %cst_8 = arith.constant dense<0.000000e+00> : vector<64x8xf32>
    %11 = tpu.matmul %3, %10, %cst_8 {dimension_numbers = #tpu.dot_dimension_numbers<[1], [0], [0], [1], [0, 0, 1, 1], [], []>} : vector<64x8xf32>, vector<8x8xf32>, vector<64x8xf32> -> vector<64x8xf32>
    %12 = vector.broadcast %9 : vector<64x1xf32> to vector<64x8xf32>
    %13 = arith.mulf %12, %11 : vector<64x8xf32>
    %14 = arith.truncf %13 : vector<64x8xf32> to vector<64x8xbf16>
    %cst_9 = arith.constant dense<0.000000e+00> : vector<64x8xf32>
    %15 = tpu.matmul %1, %14, %cst_9 {dimension_numbers = #tpu.dot_dimension_numbers<[1], [0], [0], [1], [0, 0, 1, 1], [], []>} : vector<64x64xbf16>, vector<64x8xbf16>, vector<64x8xf32> -> vector<64x8xf32>
    %16 = arith.addf %15, %13 : vector<64x8xf32>
    %17 = vector.broadcast %9 : vector<64x1xf32> to vector<64x8xf32>
    %18 = arith.mulf %17, %16 : vector<64x8xf32>
    %cst_10 = arith.constant 0.000000e+00 : f32
    %19 = vector.broadcast %cst_10 : f32 to vector<64x8xf32>
    %20 = arith.maximumf %18, %19 : vector<64x8xf32>
    %c0_11 = arith.constant 0 : index
    %c0_12 = arith.constant 0 : index
    %c0_13 = arith.constant 0 : index
    %21 = vector.load %arg4[%c0_11, %c0_12, %c0_13] : memref<1x64x8xf32, #tpu.memory_space<vmem>>, vector<1x64x8xf32>
    %22 = vector.shape_cast %21 : vector<1x64x8xf32> to vector<64x8xf32>
    %23 = vector.shape_cast %20 : vector<64x8xf32> to vector<1x64x8xf32>
    tpu.vector_store %arg4[%c0_11, %c0_12, %c0_13], %23 {strides = array<i32>} : memref<1x64x8xf32, #tpu.memory_space<vmem>>, vector<1x64x8xf32>,
    %24 = arith.truncf %20 : vector<64x8xf32> to vector<64x8xbf16>
    %cst_14 = arith.constant dense<0.000000e+00> : vector<64x8xf32>
    %25 = tpu.matmul %1, %24, %cst_14 {dimension_numbers = #tpu.dot_dimension_numbers<[1], [0], [0], [1], [0, 0, 1, 1], [], []>} : vector<64x64xbf16>, vector<64x8xbf16>, vector<64x8xf32> -> vector<64x8xf32>
    %cst_15 = arith.constant 1.000000e+00 : f32
    %26 = vector.broadcast %cst_15 : f32 to vector<64x1xf32>
    %27 = arith.maximumf %6, %26 : vector<64x1xf32>
    %28 = vector.broadcast %27 : vector<64x1xf32> to vector<64x8xf32>
    %29 = arith.divf %25, %28 : vector<64x8xf32>
    %30 = arith.subf %20, %29 : vector<64x8xf32>
    %31 = math.absf %30 : vector<64x8xf32>
    %cst_16 = arith.constant 1.000000e+00 : f32
    %32 = vector.broadcast %cst_16 : f32 to vector<1x8xf32>
    %33 = tpu.transpose %31, [1, 0] : vector<64x8xf32> -> vector<8x64xf32>
    %cst_17 = arith.constant dense<0.000000e+00> : vector<1x64xf32>
    %34 = tpu.matmul %32, %33, %cst_17 {dimension_numbers = #tpu.dot_dimension_numbers<[1], [0], [0], [1], [0, 0, 1, 1], [], []>} : vector<1x8xf32>, vector<8x64xf32>, vector<1x64xf32> -> vector<1x64xf32>
    %35 = tpu.iota {dimensions = array<i32: 1>} : vector<1x64xi32>
    %c56_i32 = arith.constant 56 : i32
    %36 = vector.broadcast %c56_i32 : i32 to vector<1x64xi32>
    %37 = arith.cmpi slt, %35, %36 : vector<1x64xi32>
    %cst_18 = arith.constant -1.000000e+30 : f32
    %38 = vector.broadcast %cst_18 : f32 to vector<1x64xf32>
    %39 = arith.select %37, %34, %38 : vector<1x64xi1>, vector<1x64xf32>
    %c0_19 = arith.constant 0 : index
    %c0_20 = arith.constant 0 : index
    %c0_21 = arith.constant 0 : index
    %40 = vector.load %arg5[%c0_19, %c0_20, %c0_21] : memref<1x1x64xf32, #tpu.memory_space<vmem>>, vector<1x1x64xf32>
    %41 = vector.shape_cast %40 : vector<1x1x64xf32> to vector<1x64xf32>
    %42 = vector.shape_cast %39 : vector<1x64xf32> to vector<1x1x64xf32>
    tpu.vector_store %arg5[%c0_19, %c0_20, %c0_21], %42 {strides = array<i32>} : memref<1x1x64xf32, #tpu.memory_space<vmem>>, vector<1x1x64xf32>,
    return
  }
  func.func @transform_0(%arg0: i32) -> (i32, i32, i32) {
    %c0_i32 = arith.constant 0 : i32
    %c0_i32_0 = arith.constant 0 : i32
    %c0_i32_1 = arith.constant 0 : i32
    return %arg0, %c0_i32, %c0_i32_0 : i32, i32, i32
  }
  func.func @transform_1(%arg0: i32) -> (i32, i32, i32) {
    %c0_i32 = arith.constant 0 : i32
    %c0_i32_0 = arith.constant 0 : i32
    %c0_i32_1 = arith.constant 0 : i32
    return %arg0, %c0_i32, %c0_i32_0 : i32, i32, i32
  }
  func.func @transform_2(%arg0: i32) -> (i32, i32) {
    %c0_i32 = arith.constant 0 : i32
    %c0_i32_0 = arith.constant 0 : i32
    %c0_i32_1 = arith.constant 0 : i32
    return %c0_i32, %c0_i32_0 : i32, i32
  }
  func.func @transform_3(%arg0: i32) -> (i32, i32, i32) {
    %c0_i32 = arith.constant 0 : i32
    %c0_i32_0 = arith.constant 0 : i32
    %c0_i32_1 = arith.constant 0 : i32
    return %arg0, %c0_i32, %c0_i32_0 : i32, i32, i32
  }
  func.func @transform_4(%arg0: i32) -> (i32, i32, i32) {
    %c0_i32 = arith.constant 0 : i32
    %c0_i32_0 = arith.constant 0 : i32
    %c0_i32_1 = arith.constant 0 : i32
    return %arg0, %c0_i32, %c0_i32_0 : i32, i32, i32
  }
}

module attributes {stable_mosaic.version = 11 : i64} {
  func.func @_head_kernel(%arg0: i32, %arg1: memref<2x64x8xf32, #tpu.memory_space<vmem>>, %arg2: memref<2x32x8xf32, #tpu.memory_space<vmem>>, %arg3: memref<2x256xf32, #tpu.memory_space<vmem>>, %arg4: memref<256x16xf32, #tpu.memory_space<vmem>>, %arg5: memref<8x16xf32, #tpu.memory_space<vmem>>, %arg6: memref<8x16xf32, #tpu.memory_space<vmem>>, %arg7: memref<1x16xf32, #tpu.memory_space<vmem>>, %arg8: memref<1x16xf32, #tpu.memory_space<vmem>>, %arg9: memref<1x16xf32, #tpu.memory_space<vmem>>, %arg10: memref<16x1xf32, #tpu.memory_space<vmem>>, %arg11: memref<1x1xf32, #tpu.memory_space<vmem>>, %arg12: memref<2x1xf32, #tpu.memory_space<vmem>>) attributes {dimension_semantics = [#tpu.dimension_semantics<arbitrary>], iteration_bounds = array<i64: 1>, scalar_prefetch = 0 : i64, scratch_operands = 0 : i64, tpu.core_type = #tpu.core_type<tc>, window_params = [{pipeline_mode = #tpu.pipeline_mode<synchronous>, transform_indices = @transform_0, window_bounds = array<i64: 2, 64, 8>}, {pipeline_mode = #tpu.pipeline_mode<synchronous>, transform_indices = @transform_1, window_bounds = array<i64: 2, 32, 8>}, {pipeline_mode = #tpu.pipeline_mode<synchronous>, transform_indices = @transform_2, window_bounds = array<i64: 2, 256>}, {pipeline_mode = #tpu.pipeline_mode<synchronous>, transform_indices = @transform_3, window_bounds = array<i64: 256, 16>}, {pipeline_mode = #tpu.pipeline_mode<synchronous>, transform_indices = @transform_4, window_bounds = array<i64: 8, 16>}, {pipeline_mode = #tpu.pipeline_mode<synchronous>, transform_indices = @transform_5, window_bounds = array<i64: 8, 16>}, {pipeline_mode = #tpu.pipeline_mode<synchronous>, transform_indices = @transform_6, window_bounds = array<i64: 1, 16>}, {pipeline_mode = #tpu.pipeline_mode<synchronous>, transform_indices = @transform_7, window_bounds = array<i64: 1, 16>}, {pipeline_mode = #tpu.pipeline_mode<synchronous>, transform_indices = @transform_8, window_bounds = array<i64: 1, 16>}, {pipeline_mode = #tpu.pipeline_mode<synchronous>, transform_indices = @transform_9, window_bounds = array<i64: 16, 1>}, {pipeline_mode = #tpu.pipeline_mode<synchronous>, transform_indices = @transform_10, window_bounds = array<i64: 1, 1>}, {pipeline_mode = #tpu.pipeline_mode<synchronous>, transform_indices = @transform_11, window_bounds = array<i64: 2, 1>}]} {
    %c0 = arith.constant 0 : index
    %c0_0 = arith.constant 0 : index
    %c0_1 = arith.constant 0 : index
    %0 = vector.load %arg1[%c0, %c0_0, %c0_1] : memref<2x64x8xf32, #tpu.memory_space<vmem>>, vector<2x64x8xf32>
    %c0_2 = arith.constant 0 : index
    %c0_3 = arith.constant 0 : index
    %c0_4 = arith.constant 0 : index
    %1 = vector.load %arg2[%c0_2, %c0_3, %c0_4] : memref<2x32x8xf32, #tpu.memory_space<vmem>>, vector<2x32x8xf32>
    %cst = arith.constant dense<0xFF800000> : vector<2x8xf32>
    %2 = vector.multi_reduction <maximumf>, %0, %cst [1] : vector<2x64x8xf32> to vector<2x8xf32>
    %cst_5 = arith.constant dense<0.000000e+00> : vector<2x8xf32>
    %3 = vector.multi_reduction <add>, %0, %cst_5 [1] : vector<2x64x8xf32> to vector<2x8xf32>
    %cst_6 = arith.constant 0.0178571437 : f32
    %4 = vector.broadcast %cst_6 : f32 to vector<2x8xf32>
    %5 = arith.mulf %3, %4 : vector<2x8xf32>
    %cst_7 = arith.constant dense<0xFF800000> : vector<2x8xf32>
    %6 = vector.multi_reduction <maximumf>, %1, %cst_7 [1] : vector<2x32x8xf32> to vector<2x8xf32>
    %cst_8 = arith.constant dense<0.000000e+00> : vector<2x8xf32>
    %7 = vector.multi_reduction <add>, %1, %cst_8 [1] : vector<2x32x8xf32> to vector<2x8xf32>
    %cst_9 = arith.constant 0.0357142873 : f32
    %8 = vector.broadcast %cst_9 : f32 to vector<2x8xf32>
    %9 = arith.mulf %7, %8 : vector<2x8xf32>
    %cst_10 = arith.constant 0.000000e+00 : f32
    %10 = vector.broadcast %cst_10 : f32 to vector<2x8xf32>
    %11 = arith.maximumf %2, %10 : vector<2x8xf32>
    %cst_11 = arith.constant 0.000000e+00 : f32
    %12 = vector.broadcast %cst_11 : f32 to vector<2x8xf32>
    %13 = arith.maximumf %6, %12 : vector<2x8xf32>
    %14 = arith.addf %11, %13 : vector<2x8xf32>
    %cst_12 = arith.constant 0.000000e+00 : f32
    %15 = vector.broadcast %cst_12 : f32 to vector<2x8xf32>
    %16 = arith.maximumf %5, %15 : vector<2x8xf32>
    %cst_13 = arith.constant 0.000000e+00 : f32
    %17 = vector.broadcast %cst_13 : f32 to vector<2x8xf32>
    %18 = arith.maximumf %9, %17 : vector<2x8xf32>
    %19 = arith.addf %16, %18 : vector<2x8xf32>
    %c0_14 = arith.constant 0 : index
    %c0_15 = arith.constant 0 : index
    %20 = vector.load %arg3[%c0_14, %c0_15] : memref<2x256xf32, #tpu.memory_space<vmem>>, vector<2x256xf32>
    %cst_16 = arith.constant 0.000000e+00 : f32
    %21 = vector.broadcast %cst_16 : f32 to vector<2x256xf32>
    %22 = arith.maximumf %20, %21 : vector<2x256xf32>
    %c0_17 = arith.constant 0 : index
    %c0_18 = arith.constant 0 : index
    %23 = vector.load %arg4[%c0_17, %c0_18] : memref<256x16xf32, #tpu.memory_space<vmem>>, vector<256x16xf32>
    %cst_19 = arith.constant dense<0.000000e+00> : vector<2x16xf32>
    %24 = tpu.matmul %22, %23, %cst_19 {dimension_numbers = #tpu.dot_dimension_numbers<[1], [0], [0], [1], [0, 0, 1, 1], [], []>} : vector<2x256xf32>, vector<256x16xf32>, vector<2x16xf32> -> vector<2x16xf32>
    %c0_20 = arith.constant 0 : index
    %c0_21 = arith.constant 0 : index
    %25 = vector.load %arg5[%c0_20, %c0_21] : memref<8x16xf32, #tpu.memory_space<vmem>>, vector<8x16xf32>
    %cst_22 = arith.constant dense<0.000000e+00> : vector<2x16xf32>
    %26 = tpu.matmul %14, %25, %cst_22 {dimension_numbers = #tpu.dot_dimension_numbers<[1], [0], [0], [1], [0, 0, 1, 1], [], []>} : vector<2x8xf32>, vector<8x16xf32>, vector<2x16xf32> -> vector<2x16xf32>
    %27 = arith.addf %24, %26 : vector<2x16xf32>
    %c0_23 = arith.constant 0 : index
    %c0_24 = arith.constant 0 : index
    %28 = vector.load %arg6[%c0_23, %c0_24] : memref<8x16xf32, #tpu.memory_space<vmem>>, vector<8x16xf32>
    %cst_25 = arith.constant dense<0.000000e+00> : vector<2x16xf32>
    %29 = tpu.matmul %19, %28, %cst_25 {dimension_numbers = #tpu.dot_dimension_numbers<[1], [0], [0], [1], [0, 0, 1, 1], [], []>} : vector<2x8xf32>, vector<8x16xf32>, vector<2x16xf32> -> vector<2x16xf32>
    %30 = arith.addf %27, %29 : vector<2x16xf32>
    %c0_26 = arith.constant 0 : index
    %c0_27 = arith.constant 0 : index
    %31 = vector.load %arg7[%c0_26, %c0_27] : memref<1x16xf32, #tpu.memory_space<vmem>>, vector<1x16xf32>
    %32 = vector.broadcast %31 : vector<1x16xf32> to vector<2x16xf32>
    %33 = arith.addf %30, %32 : vector<2x16xf32>
    %cst_28 = arith.constant 0.000000e+00 : f32
    %34 = vector.broadcast %cst_28 : f32 to vector<2x16xf32>
    %35 = arith.maximumf %33, %34 : vector<2x16xf32>
    %cst_29 = arith.constant dense<0.000000e+00> : vector<16xf32>
    %36 = vector.multi_reduction <add>, %35, %cst_29 [0] : vector<2x16xf32> to vector<16xf32>
    %37 = vector.shape_cast %36 : vector<16xf32> to vector<1x16xf32>
    %cst_30 = arith.constant 2.000000e+00 : f32
    %38 = vector.broadcast %cst_30 : f32 to vector<1x16xf32>
    %39 = arith.divf %37, %38 : vector<1x16xf32>
    %40 = vector.broadcast %39 : vector<1x16xf32> to vector<2x16xf32>
    %41 = arith.subf %35, %40 : vector<2x16xf32>
    %42 = arith.mulf %41, %41 : vector<2x16xf32>
    %cst_31 = arith.constant dense<0.000000e+00> : vector<16xf32>
    %43 = vector.multi_reduction <add>, %42, %cst_31 [0] : vector<2x16xf32> to vector<16xf32>
    %44 = vector.shape_cast %43 : vector<16xf32> to vector<1x16xf32>
    %cst_32 = arith.constant 2.000000e+00 : f32
    %45 = vector.broadcast %cst_32 : f32 to vector<1x16xf32>
    %46 = arith.divf %44, %45 : vector<1x16xf32>
    %47 = vector.broadcast %39 : vector<1x16xf32> to vector<2x16xf32>
    %48 = arith.subf %35, %47 : vector<2x16xf32>
    %cst_33 = arith.constant 9.99999974E-6 : f32
    %49 = vector.broadcast %cst_33 : f32 to vector<1x16xf32>
    %50 = arith.addf %46, %49 : vector<1x16xf32>
    %51 = math.rsqrt %50 : vector<1x16xf32>
    %52 = vector.broadcast %51 : vector<1x16xf32> to vector<2x16xf32>
    %53 = arith.mulf %48, %52 : vector<2x16xf32>
    %c0_34 = arith.constant 0 : index
    %c0_35 = arith.constant 0 : index
    %54 = vector.load %arg8[%c0_34, %c0_35] : memref<1x16xf32, #tpu.memory_space<vmem>>, vector<1x16xf32>
    %55 = vector.broadcast %54 : vector<1x16xf32> to vector<2x16xf32>
    %56 = arith.mulf %53, %55 : vector<2x16xf32>
    %c0_36 = arith.constant 0 : index
    %c0_37 = arith.constant 0 : index
    %57 = vector.load %arg9[%c0_36, %c0_37] : memref<1x16xf32, #tpu.memory_space<vmem>>, vector<1x16xf32>
    %58 = vector.broadcast %57 : vector<1x16xf32> to vector<2x16xf32>
    %59 = arith.addf %56, %58 : vector<2x16xf32>
    %c0_38 = arith.constant 0 : index
    %c0_39 = arith.constant 0 : index
    %60 = vector.load %arg10[%c0_38, %c0_39] : memref<16x1xf32, #tpu.memory_space<vmem>>, vector<16x1xf32>
    %cst_40 = arith.constant dense<0.000000e+00> : vector<2x1xf32>
    %61 = tpu.matmul %59, %60, %cst_40 {dimension_numbers = #tpu.dot_dimension_numbers<[1], [0], [0], [1], [0, 0, 1, 1], [], []>} : vector<2x16xf32>, vector<16x1xf32>, vector<2x1xf32> -> vector<2x1xf32>
    %c0_41 = arith.constant 0 : index
    %c0_42 = arith.constant 0 : index
    %62 = vector.load %arg11[%c0_41, %c0_42] : memref<1x1xf32, #tpu.memory_space<vmem>>, vector<1x1xf32>
    %63 = vector.broadcast %62 : vector<1x1xf32> to vector<2x1xf32>
    %64 = arith.addf %61, %63 : vector<2x1xf32>
    %c0_43 = arith.constant 0 : index
    %c0_44 = arith.constant 0 : index
    %65 = vector.load %arg12[%c0_43, %c0_44] : memref<2x1xf32, #tpu.memory_space<vmem>>, vector<2x1xf32>
    tpu.vector_store %arg12[%c0_43, %c0_44], %64 {strides = array<i32>} : memref<2x1xf32, #tpu.memory_space<vmem>>, vector<2x1xf32>,
    return
  }
  func.func @transform_0(%arg0: i32) -> (i32, i32, i32) {
    %c0_i32 = arith.constant 0 : i32
    %c0_i32_0 = arith.constant 0 : i32
    %c0_i32_1 = arith.constant 0 : i32
    %c0_i32_2 = arith.constant 0 : i32
    return %c0_i32, %c0_i32_0, %c0_i32_1 : i32, i32, i32
  }
  func.func @transform_1(%arg0: i32) -> (i32, i32, i32) {
    %c0_i32 = arith.constant 0 : i32
    %c0_i32_0 = arith.constant 0 : i32
    %c0_i32_1 = arith.constant 0 : i32
    %c0_i32_2 = arith.constant 0 : i32
    return %c0_i32, %c0_i32_0, %c0_i32_1 : i32, i32, i32
  }
  func.func @transform_2(%arg0: i32) -> (i32, i32) {
    %c0_i32 = arith.constant 0 : i32
    %c0_i32_0 = arith.constant 0 : i32
    %c0_i32_1 = arith.constant 0 : i32
    return %c0_i32, %c0_i32_0 : i32, i32
  }
  func.func @transform_3(%arg0: i32) -> (i32, i32) {
    %c0_i32 = arith.constant 0 : i32
    %c0_i32_0 = arith.constant 0 : i32
    %c0_i32_1 = arith.constant 0 : i32
    return %c0_i32, %c0_i32_0 : i32, i32
  }
  func.func @transform_4(%arg0: i32) -> (i32, i32) {
    %c0_i32 = arith.constant 0 : i32
    %c0_i32_0 = arith.constant 0 : i32
    %c0_i32_1 = arith.constant 0 : i32
    return %c0_i32, %c0_i32_0 : i32, i32
  }
  func.func @transform_5(%arg0: i32) -> (i32, i32) {
    %c0_i32 = arith.constant 0 : i32
    %c0_i32_0 = arith.constant 0 : i32
    %c0_i32_1 = arith.constant 0 : i32
    return %c0_i32, %c0_i32_0 : i32, i32
  }
  func.func @transform_6(%arg0: i32) -> (i32, i32) {
    %c0_i32 = arith.constant 0 : i32
    %c0_i32_0 = arith.constant 0 : i32
    %c0_i32_1 = arith.constant 0 : i32
    return %c0_i32, %c0_i32_0 : i32, i32
  }
  func.func @transform_7(%arg0: i32) -> (i32, i32) {
    %c0_i32 = arith.constant 0 : i32
    %c0_i32_0 = arith.constant 0 : i32
    %c0_i32_1 = arith.constant 0 : i32
    return %c0_i32, %c0_i32_0 : i32, i32
  }
  func.func @transform_8(%arg0: i32) -> (i32, i32) {
    %c0_i32 = arith.constant 0 : i32
    %c0_i32_0 = arith.constant 0 : i32
    %c0_i32_1 = arith.constant 0 : i32
    return %c0_i32, %c0_i32_0 : i32, i32
  }
  func.func @transform_9(%arg0: i32) -> (i32, i32) {
    %c0_i32 = arith.constant 0 : i32
    %c0_i32_0 = arith.constant 0 : i32
    %c0_i32_1 = arith.constant 0 : i32
    return %c0_i32, %c0_i32_0 : i32, i32
  }
  func.func @transform_10(%arg0: i32) -> (i32, i32) {
    %c0_i32 = arith.constant 0 : i32
    %c0_i32_0 = arith.constant 0 : i32
    %c0_i32_1 = arith.constant 0 : i32
    return %c0_i32, %c0_i32_0 : i32, i32
  }
  func.func @transform_11(%arg0: i32) -> (i32, i32) {
    %c0_i32 = arith.constant 0 : i32
    %c0_i32_0 = arith.constant 0 : i32
    %c0_i32_1 = arith.constant 0 : i32
    return %c0_i32, %c0_i32_0 : i32, i32
  }
}

</mosaic_0001>

<bundles_post_ra>
// kernel: mybraingnn_forward.3
= control target key start
LH: loop header
LB: loop body
LE: loop exit
PB: predicated region body
PF: predicated region fallthrough
CT: control target
= control target key end

     0   :  { %s1530_s15 = smov 0   ;;  %s2001_s0 = inlined_call_operand.vmem [shape: bf16[2,128,128], index: 0, kind: input, shape index: {}]   ;;  %s2002_s1 = inlined_call_operand.vmem [shape: f32[2,128,8], index: 1, kind: input, shape index: {}]   ;;  %s2003_s2 = inlined_call_operand.vmem [shape: f32[8,8], index: 2, kind: input, shape index: {}]   ;;  %s2004_s3 = inlined_call_operand.vmem [shape: f32[2,128,8], index: 3, kind: output, shape index: {0}]   ;;  %s2005_s4 = inlined_call_operand.vmem [shape: f32[2,1,128], index: 4, kind: output, shape index: {1}]  }
   0x1 LB: > { %s1155_s16 = sadd.s32 4294967295, %s1500_s15   ;;  %p1159_p0 = scmp.ge.s32.totalorder %s1500_s15, 1  ;;  %s1500_s15 = sphi %s1530_s15, %s15_s15  }
   0x2   : > { %p175_p1 = scmp.lt.s32.totalorder %s1500_s15, 3 }
   0x4   : > { %p176_p2 = pnand %p1159_p0, %p175_p1 }
   0x6   : > { %179 = sbr.rel (%p176_p2) target bundleno = 1023 (0x3ff), region = 32 }
   0xb   : > { %v340_v0 = vld [vmem:[%s2003_s2] sm:$0xff]  ;;  %p209_p3 = scmp.lt.s32.totalorder %s1155_s16, 1  ;;  %vm341_vm0 = vcmask 64512   ;;  %vm1503_vm1 = vmmov 0  }
   0xc   : > { %1278 = vmatprep.subr.mxu1 %v340_v0 }
   0xd   : > { %1279 = vmatpush3.msra.mxu1 %v340_v0  ;;  %s2010_s16 = smov (!%p209_p3, %s1155_s16), 1 }
   0xe   : > { %s1210_s19 = sshll.u32 %s2010_s16, 7  ;;  %s1209_s20 = sshll.u32 %s2010_s16, 6 }
   0xf   : > { %s1550_s23 = scalar_lea.vmem %s2002_s1, %s1210_s19  ;;  %s1558_s26 = scalar_lea.vmem %s2001_s0, %s1209_s20 }
  0x10   : > { %v244_v1 = vld [vmem:[%s1550_s23] sm:$0xff]  ;;  %v245_v2 = vld [vmem:[%s1550_s23 + $0x8] sm:$0xff]  ;;  %v246_v3 = vld [vmem:[%s1550_s23 + $0x10] sm:$0xff]  ;;  %s1778_s29 = scalar_lea.vmem %s2004_s3, %s1210_s19  ;;  %s226_s6 = scalar_lea.vmem %s2005_s4, %s2010_s16 }
  0x11   : > { %1280 = vmatprep.mubr.msk.f32.mxu1 %vm341_vm0, %v244_v1  ;;  %v1563_v4 = vld [vmem:[%s1558_s26 + $0x30] sm:$0xff]   ;;  %v247_v5 = vld [vmem:[%s1550_s23 + $0x18] sm:$0xff]  ;;  %v248_v8 = vld [vmem:[%s1550_s23 + $0x20] sm:$0xff] }
  0x12   : > { %1281 = vmatmul.mubr.msk.f32.vlgmr.msra.gmra.mxu1 %vm341_vm0, %v245_v2  ;;  %v272_v6 = vunpack.c.l.bf16 %v1563_v4  ;;  %v1569_v7 = vld [vmem:[%s1558_s26 + $0x38] sm:$0xff]   ;;  %v273_v10 = vunpack.c.h.bf16 %v1563_v4  ;;  %v1577_v12 = vld [vmem:[%s1558_s26 + $0x28] sm:$0xff]   ;;  %v250_v14 = vld [vmem:[%s1550_s23 + $0x30] sm:$0xff] }
  0x13   : > { %1283 = vmatprep.mubr.msk.f32.mxu1 %vm341_vm0, %v246_v3  ;;  %v274_v9 = vunpack.c.l.bf16 %v1569_v7  ;;  %v275_v11 = vunpack.c.h.bf16 %v1569_v7  ;;  %v249_v13 = vld [vmem:[%s1550_s23 + $0x28] sm:$0xff]  ;;  %v271_v15 = vunpack.c.h.bf16 %v1577_v12  ;;  %v270_v16 = vunpack.c.l.bf16 %v1577_v12  ;;  %v1586_v17 = vld [vmem:[%s1558_s26 + $0x20] sm:$0xff]   ;;  %v251_v18 = vld [vmem:[%s1550_s23 + $0x38] sm:$0xff] }
  0x14   : > { %300 = vadd.xlane.f32.xlu1 %v272_v6  ;;  %v252_v19 = vld [vmem:[%s1550_s23 + $0x40] sm:$0xff]  ;;  %v269_v20 = vunpack.c.h.bf16 %v1586_v17  ;;  %v268_v21 = vunpack.c.l.bf16 %v1586_v17  ;;  %v1595_v22 = vld [vmem:[%s1558_s26 + $0x18] sm:$0xff]   ;;  %v253_v23 = vld [vmem:[%s1550_s23 + $0x48] sm:$0xff] }
  0x15   : > { %304 = vadd.xlane.f32.xlu0 %v274_v9  ;;  %v254_v24 = vld [vmem:[%s1550_s23 + $0x50] sm:$0xff]  ;;  %v267_v25 = vunpack.c.h.bf16 %v1595_v22  ;;  %v266_v26 = vunpack.c.l.bf16 %v1595_v22  ;;  %v255_v28 = vld [vmem:[%s1550_s23 + $0x58] sm:$0xff]  ;;  %v256_v29 = vld [vmem:[%s1550_s23 + $0x60] sm:$0xff] }
  0x16   : > { %1284 = vmatmul.mubr.msk.f32.gmra.mxu1 %vm341_vm0, %v247_v5  ;;  %v1604_v27 = vld [vmem:[%s1558_s26 + $0x10] sm:$0xff]   ;;  %v1613_v32 = vld [vmem:[%s1558_s26 + $0x8] sm:$0xff]   ;;  %v1622_v37 = vld [vmem:[%s1558_s26] sm:$0xff]  }
  0x17   : > { %1286 = vmatprep.mubr.msk.f32.mxu1 %vm341_vm0, %v248_v8  ;;  %v265_v30 = vunpack.c.h.bf16 %v1604_v27  ;;  %v264_v31 = vunpack.c.l.bf16 %v1604_v27  ;;  %v257_v33 = vld [vmem:[%s1550_s23 + $0x68] sm:$0xff]  ;;  %v258_v34 = vld [vmem:[%s1550_s23 + $0x70] sm:$0xff]  ;;  %v263_v35 = vunpack.c.h.bf16 %v1613_v32  ;;  %v262_v36 = vunpack.c.l.bf16 %v1613_v32  ;;  %v259_v38 = vld [vmem:[%s1550_s23 + $0x78] sm:$0xff]  ;;  %1320 = vmatprep.mubr.bf16.mxu0 %v1622_v37 }
  0x18   : > { %302 = vadd.xlane.f32.xlu1 %v273_v10  ;;  %v261_v39 = vunpack.c.h.bf16 %v1622_v37  ;;  %v260_v40 = vunpack.c.l.bf16 %v1622_v37 }
  0x19   : > { %306 = vadd.xlane.f32.xlu0 %v275_v11 }
  0x1a   : > { %1287 = vmatmul.mubr.msk.f32.gmra.mxu1 %vm341_vm0, %v249_v13 }
  0x1b   : > { %1289 = vmatprep.mubr.msk.f32.mxu1 %vm341_vm0, %v250_v14 }
  0x1c   : > { %298 = vadd.xlane.f32.xlu1 %v271_v15 }
  0x1d   : > { %296 = vadd.xlane.f32.xlu0 %v270_v16 }
  0x1e   : > { %1290 = vmatmul.mubr.msk.f32.gmra.mxu1 %vm341_vm0, %v251_v18 }
  0x1f   : > { %1292 = vmatprep.mubr.msk.f32.mxu1 %vm341_vm0, %v252_v19 }
  0x20   : > { %294 = vadd.xlane.f32.xlu1 %v269_v20 }
  0x21   : > { %292 = vadd.xlane.f32.xlu0 %v268_v21 }
  0x22   : > { %1293 = vmatmul.mubr.msk.f32.gmra.mxu1 %vm341_vm0, %v253_v23 }
  0x23   : > { %1295 = vmatprep.mubr.msk.f32.mxu1 %vm341_vm0, %v254_v24 }
  0x24   : > { %290 = vadd.xlane.f32.xlu1 %v267_v25 }
  0x25   : > { %288 = vadd.xlane.f32.xlu0 %v266_v26 }
  0x26   : > { %1296 = vmatmul.mubr.msk.f32.gmra.mxu1 %vm341_vm0, %v255_v28 }
  0x27   : > { %1298 = vmatprep.mubr.msk.f32.mxu1 %vm341_vm0, %v256_v29 }
  0x28   : > { %286 = vadd.xlane.f32.xlu1 %v265_v30 }
  0x29   : > { %284 = vadd.xlane.f32.xlu0 %v264_v31 }
  0x2a   : > { %1299 = vmatmul.mubr.msk.f32.gmra.mxu1 %vm341_vm0, %v257_v33 }
  0x2b   : > { %1301 = vmatprep.mubr.msk.f32.mxu1 %vm341_vm0, %v258_v34 }
  0x2c   : > { %282 = vadd.xlane.f32.xlu1 %v263_v35 }
  0x2d   : > { %280 = vadd.xlane.f32.xlu0 %v262_v36 }
  0x2e   : > { %1302 = vmatmul.mubr.msk.f32.gmra.mxu1 %vm341_vm0, %v259_v38 }
  0x30   : > { %278 = vadd.xlane.f32.xlu1 %v261_v39 }
  0x31   : > { %276 = vadd.xlane.f32.xlu0 %v260_v40 }
  0x9d   : > { %v1632_v42 = vpop.xlane.xlu1 %300 }
  0x9e   : > { %v1630_v41 = vpop.xlane.xlu0 %304  ;;  %v320_v53 = vadd.f32 1.0, %v1632_v42 }
  0x9f   : > { %v322_v57 = vadd.f32 1.0, %v1630_v41 }
  0xa0   : > { %1430 = vrsqrt.f32 %v320_v53 }
  0xa1   : > { %v1636_v44 = vpop.xlane.xlu1 %302 }
  0xa2   : > { %v1634_v43 = vpop.xlane.xlu0 %306  ;;  %v321_v59 = vadd.f32 1.0, %v1636_v44 }
  0xa3   : > { %v323_v56 = vadd.f32 1.0, %v1634_v43 }
  0xa5   : > { %v1644_v48 = vpop.xlane.xlu1 %298  ;;  %1432 = vrsqrt.f32 %v323_v56 }
  0xa6   : > { %v1640_v46 = vpop.xlane.xlu0 %296  ;;  %1434 = vrsqrt.f32 %v322_v57  ;;  %v319_v1 = vadd.f32 1.0, %v1644_v48 }
  0xa7   : > { %v318_v62 = vadd.f32 1.0, %v1640_v46  ;;  %1436 = vrsqrt.f32 %v321_v59 }
  0xa9   : > { %v1655_v54 = vpop.xlane.xlu1 %294  ;;  %1438 = vrsqrt.f32 %v318_v62 }
  0xaa   : > { %v1650_v51 = vpop.xlane.xlu0 %292  ;;  %1440 = vrsqrt.f32 %v319_v1  ;;  %v317_v8 = vadd.f32 1.0, %v1655_v54 }
  0xab   : > { %v316_v3 = vadd.f32 1.0, %v1650_v51 }
  0xad   : > { %v1669_v63 = vpop.xlane.xlu1 %290  ;;  %1442 = vrsqrt.f32 %v316_v3  ;;  %v1683_v19 = vpop.eup %1430 }
  0xae   : > { %v1664_v60 = vpop.xlane.xlu0 %288  ;;  %1444 = vrsqrt.f32 %v317_v8  ;;  %v315_v14 = vadd.f32 1.0, %v1669_v63 }
  0xaf   : > { %v314_v11 = vadd.f32 1.0, %v1664_v60 }
  0xb1   : > { %v1676_v9 = vpop.xlane.xlu1 %286  ;;  %1446 = vrsqrt.f32 %v314_v11 }
  0xb2   : > { %v1673_v5 = vpop.xlane.xlu0 %284  ;;  %v1685_v20 = vpop.eup %1432  ;;  %1448 = vrsqrt.f32 %v315_v14  ;;  %v313_v25 = vadd.f32 1.0, %v1676_v9 }
  0xb3   : > { %2007 = vst [vmem:[#allocation2_spill] sm:$0xff] %v1673_v5  ;;  %v312_v15 = vadd.f32 1.0, %v1673_v5  ;;  %v1689_v24 = vpop.eup %1434 }
  0xb4   : > { %v1692_v26 = vpop.eup %1436 }
  0xb5   : > { %v1687_v21 = vpop.xlane.xlu1 %282  ;;  %1450 = vrsqrt.f32 %v312_v15 }
  0xb6   : > { %v1681_v16 = vpop.xlane.xlu0 %280  ;;  %v1704_v34 = vpop.eup %1438  ;;  %1452 = vrsqrt.f32 %v313_v25  ;;  %v311_v36 = vadd.f32 1.0, %v1687_v21 }
  0xb7   : > { %v310_v29 = vadd.f32 1.0, %v1681_v16  ;;  %v1714_v40 = vpop.eup %1440 }
  0xb9   : > { %v1716_v53 = vpop.xlane.xlu1 %278  ;;  %1454 = vrsqrt.f32 %v310_v29 }
  0xba   : > { %v1706_v35 = vpop.xlane.xlu0 %276  ;;  %v1724_v62 = vpop.eup %1442  ;;  %1456 = vrsqrt.f32 %v311_v36  ;;  %v309_v1 = vadd.f32 1.0, %v1716_v53 }
  0xbb   : > { %v308_v56 = vadd.f32 1.0, %v1706_v35  ;;  %v1730_v8 = vpop.eup %1444 }
  0xbd   : > { %1458 = vrsqrt.f32 %v308_v56 }
  0xbe   : > { %1460 = vrsqrt.f32 %v309_v1 }
  0xd2   : > { %v1638_v45 = vpop.f32.mrf.mxu1 }
  0xd4   : > { %v1642_v47 = vpop.f32.mrf.mxu1 }
  0xd6   : > { %v1646_v49 = vpop.f32.mrf.mxu1 }
  0xd8   : > { %v1648_v50 = vpop.f32.mrf.mxu1 }
  0xda   : > { %v1652_v52 = vpop.f32.mrf.mxu1 }
  0xdc   : > { %v1657_v55 = vpop.f32.mrf.mxu1 }
  0xde   : > { %v1661_v58 = vpop.f32.mrf.mxu1 }
  0xe0   : > { %v1666_v61 = vpop.f32.mrf.mxu1 }
  0xe2   : > { %v1294_v0 = vpop.f32.mrf.mxu1 }
  0xe3   : > { %v1740_v14 = vmul.f32 %v1730_v8, %v1294_v0 }
  0xe4   : > { %v496_v2 = vpop.f32.mrf.mxu1 }
  0xe6   : > { %v1297_v6 = vpop.f32.mrf.mxu1 }
  0xe7   : > { %v1728_v3 = vmul.f32 %v1714_v40, %v1297_v6 }
  0xe8   : > { %v506_v10 = vpop.f32.mrf.mxu1 }
  0xe9   : > { %v1720_v57 = vmul.f32 %v1704_v34, %v506_v10  ;;  %v1733_v10 = vmul.f32 %v1724_v62, %v496_v2 }
  0xea   : > { %v1300_v13 = vpop.f32.mrf.mxu1 }
  0xeb   : > { %v1710_v38 = vmul.f32 %v1692_v26, %v1300_v13  ;;  %v556_v11 = vpack.c.bf16 %v1728_v3, %v1720_v57  ;;  %v1737_v13 = vpop.eup %1446  ;;  %v555_v2 = vpack.c.bf16 %v1740_v14, %v1733_v10 }
  0xec   : > { %v516_v18 = vpop.f32.mrf.mxu1  ;;  %v1742_v6 = vpop.eup %1448 }
  0xed   : > { %v1696_v30 = vmul.f32 %v1683_v19, %v516_v18  ;;  %v1744_v15 = vpop.eup %1450  ;;  %v541_v18 = vmul.f32 %v1737_v13, %v1666_v61 }
  0xee   : > { %v1303_v23 = vpop.f32.mrf.mxu1  ;;  %v1754_v25 = vpop.eup %1452  ;;  %v539_v0 = vmul.f32 %v1744_v15, %v1657_v55 }
  0xef   : > { %v1699_v31 = vmul.f32 %v1685_v20, %v1303_v23  ;;  %v557_v59 = vpack.c.bf16 %v1710_v38, %v1696_v30  ;;  %v1752_v23 = vmul.f32 %v1742_v6, %v1661_v58  ;;  %v1455_v29 = vpop.eup %1454  ;;  %v540_v61 = vmul.f32 %v1754_v25, %v1652_v52 }
  0xf0   : > { %v526_v28 = vpop.f32.mrf.mxu1  ;;  %v1457_v36 = vpop.eup %1456 }
  0xf1   : > { %v1702_v33 = vmul.f32 %v1689_v24, %v526_v28  ;;  %v554_v28 = vpack.c.bf16 %v1752_v23, %v541_v18  ;;  %v553_v56 = vpack.c.bf16 %v540_v61, %v539_v0  ;;  %v1459_v58 = vpop.eup %1458 }
  0xf2   : > { %v1461_v1 = vpop.eup %1460  ;;  %v535_v55 = vmul.f32 %v1459_v58, %v1642_v47 }
  0xf3   : > { %v558_v39 = vpack.c.bf16 %v1699_v31, %v1702_v33 }
  0xf5   : > { %1304 = vmatprep.subr.bf16.mxu0 %v558_v39 }
  0xf6   : > { %1305 = vmatpush3.bf16.msra.mxu0 %v558_v39  ;;  %v537_v39 = vmul.f32 %v1455_v29, %v1648_v50 }
  0xf7   : > { %1306 = vmatprep.subr.bf16.mxu0 %v557_v59 }
  0xfa   : > { %1307 = vmatpush3.bf16.msra.mxu0 %v557_v59  ;;  %v538_v59 = vmul.f32 %v1457_v36, %v1646_v49 }
  0xfb   : > { %1308 = vmatprep.subr.bf16.mxu0 %v556_v11 }
  0xfe   : > { %1309 = vmatpush3.bf16.msra.mxu0 %v556_v11  ;;  %v552_v11 = vpack.c.bf16 %v538_v59, %v537_v39 }
  0xff   : > { %1310 = vmatprep.subr.bf16.mxu0 %v555_v2 }
 0x102   : > { %1311 = vmatpush3.bf16.msra.mxu0 %v555_v2  ;;  %v536_v2 = vmul.f32 %v1461_v1, %v1638_v45 }
 0x103   : > { %1312 = vmatprep.subr.bf16.mxu0 %v554_v28 }
 0x104   : > { %v551_v5 = vpack.c.bf16 %v536_v2, %v535_v55 }
 0x106   : > { %1313 = vmatpush3.bf16.msra.mxu0 %v554_v28 }
 0x107   : > { %1314 = vmatprep.subr.bf16.mxu0 %v553_v56 }
 0x10a   : > { %1315 = vmatpush3.bf16.msra.mxu0 %v553_v56 }
 0x10b   : > { %1316 = vmatprep.subr.bf16.mxu0 %v552_v11 }
 0x10e   : > { %1317 = vmatpush3.bf16.msra.mxu0 %v552_v11 }
 0x10f   : > { %1318 = vmatprep.subr.bf16.mxu0 %v551_v5 }
 0x112   : > { %1319 = vmatpush3.bf16.msra.mxu0 %v551_v5 }
 0x115   : > { %1321 = vmatmul.mubr.bf16.vlgmr.msra.gmra.mxu0 %v1613_v32 }
 0x116   : > { %1324 = vmatprep.mubr.bf16.mxu0 %v1604_v27 }
 0x11d   : > { %1325 = vmatmul.mubr.bf16.gmra.mxu0 %v1595_v22 }
 0x11e   : > { %1328 = vmatprep.mubr.bf16.mxu0 %v1586_v17 }
 0x125   : > { %1329 = vmatmul.mubr.bf16.gmra.mxu0 %v1577_v12 }
 0x126   : > { %1332 = vmatprep.mubr.bf16.mxu0 %v1563_v4 }
 0x12d   : > { %1333 = vmatmul.mubr.bf16.gmra.mxu0 %v1569_v7 }
 0x12e   : > { %1352 = vmatprep.mubr.bf16.mxu0 %v1622_v37 }
 0x1d5   : > { %v1322_v45 = vpop.f32.mrf.mxu0 }
 0x1d6   : > { %v650_v47 = vadd.f32 %v1322_v45, %v537_v39 }
 0x1d7   : > { %v641_v49 = vpop.f32.mrf.mxu0 }
 0x1d8   : > { %v706_v50 = vmul.f32 %v1455_v29, %v650_v47  ;;  %v642_v52 = vadd.f32 %v641_v49, %v535_v55 }
 0x1d9   : > { %v1323_v5 = vpop.f32.mrf.mxu0 }
 0x1da   : > { %v1780_v28 = vmax.f32 %v706_v50, 0.0  ;;  %v704_v56 = vmul.f32 %v1459_v58, %v642_v52  ;;  %v653_v11 = vadd.f32 %v1323_v5, %v538_v59 }
 0x1db   : > { %v644_v37 = vpop.f32.mrf.mxu0 }
 0x1dc   : > { %738 = vst.msk [vmem:[%s1778_s29 + $0x10] sm:$0xff] %vm341_vm0, %v1780_v28  ;;  %v1785_v29 = vmax.f32 %v704_v56, 0.0  ;;  %v707_v39 = vmul.f32 %v1457_v36, %v653_v11  ;;  %v645_v55 = vadd.f32 %v644_v37, %v536_v2 }
 0x1dd   : > { %v1326_v45 = vpop.f32.mrf.mxu0 }
 0x1de   : > { %736 = vst.msk [vmem:[%s1778_s29] sm:$0xff] %vm341_vm0, %v1785_v29  ;;  %v1790_v47 = vmax.f32 %v707_v39, 0.0  ;;  %v705_v49 = vmul.f32 %v1461_v1, %v645_v55  ;;  %v666_v50 = vadd.f32 %v1326_v45, %v541_v18 }
 0x1df   : > { %v657_v58 = vpop.f32.mrf.mxu0 }
 0x1e0   : > { %739 = vst.msk [vmem:[%s1778_s29 + $0x18] sm:$0xff] %vm341_vm0, %v1790_v47  ;;  %v1795_v59 = vmax.f32 %v705_v49, 0.0  ;;  %v710_v52 = vmul.f32 %v1737_v13, %v666_v50  ;;  %v658_v36 = vadd.f32 %v657_v58, %v539_v0 }
 0x1e1   : > { %v1327_v2 = vpop.f32.mrf.mxu0 }
 0x1e2   : > { %737 = vst.msk [vmem:[%s1778_s29 + $0x8] sm:$0xff] %vm341_vm0, %v1795_v59  ;;  %v1801_v5 = vmax.f32 %v710_v52, 0.0  ;;  %v708_v1 = vmul.f32 %v1744_v15, %v658_v36  ;;  %v669_v18 = vadd.f32 %v1327_v2, %v1752_v23 }
 0x1e3   : > { %v660_v56 = vpop.f32.mrf.mxu0 }
 0x1e4   : > { %742 = vst.msk [vmem:[%s1778_s29 + $0x30] sm:$0xff] %vm341_vm0, %v1801_v5  ;;  %v1808_v11 = vmax.f32 %v708_v1, 0.0  ;;  %v711_v13 = vmul.f32 %v1742_v6, %v669_v18  ;;  %v661_v0 = vadd.f32 %v660_v56, %v540_v61 }
 0x1e5   : > { %v1330_v37 = vpop.f32.mrf.mxu0 }
 0x1e6   : > { %740 = vst.msk [vmem:[%s1778_s29 + $0x20] sm:$0xff] %vm341_vm0, %v1808_v11  ;;  %v1814_v39 = vmax.f32 %v711_v13, 0.0  ;;  %v709_v15 = vmul.f32 %v1754_v25, %v661_v0  ;;  %v682_v23 = vadd.f32 %v1330_v37, %v1720_v57 }
 0x1e7   : > { %v673_v55 = vpop.f32.mrf.mxu0 }
 0x1e8   : > { %743 = vst.msk [vmem:[%s1778_s29 + $0x38] sm:$0xff] %vm341_vm0, %v1814_v39  ;;  %v1821_v45 = vmax.f32 %v709_v15, 0.0  ;;  %v714_v6 = vmul.f32 %v1704_v34, %v682_v23  ;;  %v674_v61 = vadd.f32 %v673_v55, %v1733_v10  ;;  %v755_v55 = vpack.c.bf16 %v1814_v39, %v1801_v5 }
 0x1e9   : > { %v1331_v49 = vpop.f32.mrf.mxu0 }
 0x1ea   : > { %741 = vst.msk [vmem:[%s1778_s29 + $0x28] sm:$0xff] %vm341_vm0, %v1821_v45  ;;  %v1828_v50 = vmax.f32 %v714_v6, 0.0  ;;  %v712_v57 = vmul.f32 %v1724_v62, %v674_v61  ;;  %v685_v25 = vadd.f32 %v1331_v49, %v1728_v3  ;;  %v754_v6 = vpack.c.bf16 %v1821_v45, %v1808_v11 }
 0x1eb   : > { %v676_v58 = vpop.f32.mrf.mxu0  ;;  %v753_v61 = vpack.c.bf16 %v1790_v47, %v1780_v28  ;;  %v752_v49 = vpack.c.bf16 %v1795_v59, %v1785_v29 }
 0x1ec   : > { %746 = vst.msk [vmem:[%s1778_s29 + $0x50] sm:$0xff] %vm341_vm0, %v1828_v50  ;;  %v1835_v52 = vmax.f32 %v712_v57, 0.0  ;;  %v715_v34 = vmul.f32 %v1714_v40, %v685_v25  ;;  %v677_v10 = vadd.f32 %v676_v58, %v1740_v14  ;;  %v1502_v57 = vmov 0.0  }
 0x1ed   : > { %v1334_v36 = vpop.f32.mrf.mxu0  ;;  %1368 = vmatprep.subr.mxu1 %v1502_v57  ;;  %1400 = vmatprep.mubr.msk.f32.mxu1 %vm1503_vm1, %v1502_v57 }
 0x1ee   : > { %744 = vst.msk [vmem:[%s1778_s29 + $0x40] sm:$0xff] %vm341_vm0, %v1835_v52  ;;  %v1842_v2 = vmax.f32 %v715_v34, 0.0  ;;  %v713_v62 = vmul.f32 %v1730_v8, %v677_v10  ;;  %v698_v3 = vadd.f32 %v1334_v36, %v1702_v33 }
 0x1ef   : > { %v689_v1 = vpop.f32.mrf.mxu0 }
 0x1f0   : > { %747 = vst.msk [vmem:[%s1778_s29 + $0x58] sm:$0xff] %vm341_vm0, %v1842_v2  ;;  %v1849_v18 = vmax.f32 %v713_v62, 0.0  ;;  %v718_v40 = vmul.f32 %v1689_v24, %v698_v3  ;;  %v690_v14 = vadd.f32 %v689_v1, %v1696_v30  ;;  %v871_v3 = vmax.f32 %v1630_v41, 1.0 }
 0x1f1   : > { %v1335_v56 = vpop.f32.mrf.mxu0  ;;  %v868_v41 = vmax.f32 %v1644_v48, 1.0 }
 0x1f2   : > { %745 = vst.msk [vmem:[%s1778_s29 + $0x48] sm:$0xff] %vm341_vm0, %v1849_v18  ;;  %v1856_v8 = vmax.f32 %v718_v40, 0.0  ;;  %v716_v33 = vmul.f32 %v1683_v19, %v690_v14  ;;  %v701_v13 = vadd.f32 %v1335_v56, %v1699_v31  ;;  %v872_v40 = vmax.f32 %v1634_v43, 1.0 }
 0x1f3   : > { %v692_v0 = vpop.f32.mrf.mxu0 }
 0x1f4   : > { %750 = vst.msk [vmem:[%s1778_s29 + $0x70] sm:$0xff] %vm341_vm0, %v1856_v8  ;;  %v1863_v37 = vmax.f32 %v716_v33, 0.0  ;;  %v719_v24 = vmul.f32 %v1685_v20, %v701_v13  ;;  %v693_v30 = vadd.f32 %v692_v0, %v1710_v38  ;;  %v756_v38 = vpack.c.bf16 %v1849_v18, %v1835_v52 }
 0x1f5   : > { %v870_v33 = vmax.f32 %v1636_v44, 1.0 }
 0x1f6   : > { %748 = vst.msk [vmem:[%s1778_s29 + $0x60] sm:$0xff] %vm341_vm0, %v1863_v37  ;;  %v1870_v15 = vmax.f32 %v719_v24, 0.0  ;;  %v717_v23 = vmul.f32 %v1692_v26, %v693_v30  ;;  %v757_v26 = vpack.c.bf16 %v1842_v2, %v1828_v50  ;;  %v869_v24 = vmax.f32 %v1632_v42, 1.0 }
 0x1f7   : > { %v866_v42 = vmax.f32 %v1655_v54, 1.0  ;;  %v864_v54 = vmax.f32 %v1669_v63, 1.0 }
 0x1f8   : > { %751 = vst.msk [vmem:[%s1778_s29 + $0x78] sm:$0xff] %vm341_vm0, %v1870_v15  ;;  %v1876_v19 = vmax.f32 %v717_v23, 0.0  ;;  %v759_v31 = vpack.c.bf16 %v1870_v15, %v1856_v8 }
 0x1fa   : > { %749 = vst.msk [vmem:[%s1778_s29 + $0x68] sm:$0xff] %vm341_vm0, %v1876_v19  ;;  %1336 = vmatprep.subr.bf16.mxu0 %v759_v31  ;;  %v758_v20 = vpack.c.bf16 %v1876_v19, %v1863_v37 }
 0x1fb   : > { %1337 = vmatpush3.bf16.msra.mxu0 %v759_v31 }
 0x1fc   : > { %1338 = vmatprep.subr.bf16.mxu0 %v758_v20 }
 0x1ff   : > { %1339 = vmatpush3.bf16.msra.mxu0 %v758_v20 }
 0x200   : > { %1340 = vmatprep.subr.bf16.mxu0 %v757_v26 }
 0x203   : > { %1341 = vmatpush3.bf16.msra.mxu0 %v757_v26  ;;  %v867_v26 = vmax.f32 %v1640_v46, 1.0 }
 0x204   : > { %1342 = vmatprep.subr.bf16.mxu0 %v756_v38 }
 0x207   : > { %1343 = vmatpush3.bf16.msra.mxu0 %v756_v38 }
 0x208   : > { %1344 = vmatprep.subr.bf16.mxu0 %v755_v55 }
 0x20b   : > { %1345 = vmatpush3.bf16.msra.mxu0 %v755_v55 }
 0x20c   : > { %1346 = vmatprep.subr.bf16.mxu0 %v754_v6 }
 0x20f   : > { %1347 = vmatpush3.bf16.msra.mxu0 %v754_v6 }
 0x210   : > { %1348 = vmatprep.subr.bf16.mxu0 %v753_v61 }
 0x213   : > { %1349 = vmatpush3.bf16.msra.mxu0 %v753_v61 }
 0x214   : > { %1350 = vmatprep.subr.bf16.mxu0 %v752_v49 }
 0x217   : > { %1351 = vmatpush3.bf16.msra.mxu0 %v752_v49 }
 0x21a   : > { %1353 = vmatmul.mubr.bf16.vlgmr.msra.gmra.mxu0 %v1613_v32  ;;  %v859_v32 = vmax.f32 %v1681_v16, 1.0 }
 0x21b   : > { %1356 = vmatprep.mubr.bf16.mxu0 %v1604_v27  ;;  %v857_v27 = vmax.f32 %v1706_v35, 1.0 }
 0x21c   : > { %1462 = vrcp.f32 %v859_v32 }
 0x21d   : > { %1464 = vrcp.f32 %v857_v27 }
 0x222   : > { %1357 = vmatmul.mubr.bf16.gmra.mxu0 %v1595_v22  ;;  %v860_v22 = vmax.f32 %v1687_v21, 1.0 }
 0x223   : > { %1360 = vmatprep.mubr.bf16.mxu0 %v1586_v17  ;;  %v858_v17 = vmax.f32 %v1716_v53, 1.0 }
 0x224   : > { %1466 = vrcp.f32 %v860_v22 }
 0x225   : > { %1468 = vrcp.f32 %v858_v17  ;;  %v865_v17 = vmax.f32 %v1650_v51, 1.0 }
 0x226   : > { %1470 = vrcp.f32 %v871_v3 }
 0x227   : > { %1472 = vrcp.f32 %v872_v40 }
 0x228   : > { %1474 = vrcp.f32 %v870_v33  ;;  %v2008_v33 = vld [vmem:[#allocation2_spill] sm:$0xff] }
 0x229   : > { %1476 = vrcp.f32 %v869_v24  ;;  %v861_v24 = vmax.f32 %v2008_v33, 1.0 }
 0x22a   : > { %1361 = vmatmul.mubr.bf16.gmra.mxu0 %v1577_v12  ;;  %1478 = vrcp.f32 %v868_v41 }
 0x22b   : > { %1364 = vmatprep.mubr.bf16.mxu0 %v1563_v4  ;;  %v1463_v4 = vpop.eup %1462  ;;  %1480 = vrcp.f32 %v867_v26 }
 0x22c   : > { %v1465_v25 = vpop.eup %1464  ;;  %1482 = vrcp.f32 %v866_v42 }
 0x22d   : > { %1484 = vrcp.f32 %v865_v17 }
 0x22e   : > { %1486 = vrcp.f32 %v864_v54 }
 0x231   : > { %v1467_v10 = vpop.eup %1466 }
 0x232   : > { %1365 = vmatmul.mubr.bf16.gmra.mxu0 %v1569_v7  ;;  %v1469_v35 = vpop.eup %1468 }
 0x233   : > { %v1471_v20 = vpop.eup %1470 }
 0x234   : > { %v1473_v38 = vpop.eup %1472 }
 0x235   : > { %v1475_v32 = vpop.eup %1474 }
 0x236   : > { %v1477_v46 = vpop.eup %1476 }
 0x2da   : > { %v1354_v7 = vpop.f32.mrf.mxu0 }
 0x2db   : > { %v1910_v12 = vmul.f32 %v1463_v4, %v1354_v7 }
 0x2dc   : > { %v794_v58 = vpop.f32.mrf.mxu0 }
 0x2dd   : > { %v1912_v34 = vmul.f32 %v1465_v25, %v794_v58 }
 0x2de   : > { %v1355_v16 = vpop.f32.mrf.mxu0 }
 0x2df   : > { %v1914_v36 = vmul.f32 %v1467_v10, %v1355_v16  ;;  %v863_v10 = vmax.f32 %v1664_v60, 1.0 }
 0x2e0   : > { %v797_v21 = vpop.f32.mrf.mxu0 }
 0x2e1   : > { %v1916_v62 = vmul.f32 %v1469_v35, %v797_v21  ;;  %1488 = vrcp.f32 %v863_v10  ;;  %v862_v21 = vmax.f32 %v1676_v9, 1.0 }
 0x2e2   : > { %v1918_v53 = vpop.f32.mrf.mxu0 }
 0x2e3   : > { %1490 = vrcp.f32 %v862_v21  ;;  %v906_v42 = vsub.f32 %v1795_v59, %v1916_v62 }
 0x2e4   : > { %v1921_v1 = vpop.f32.mrf.mxu0  ;;  %1492 = vrcp.f32 %v861_v24 }
 0x2e6   : > { %v1924_v14 = vpop.f32.mrf.mxu0 }
 0x2e8   : > { %v1926_v56 = vpop.f32.mrf.mxu0 }
 0x2ea   : > { %v1362_v13 = vpop.f32.mrf.mxu0 }
 0x2ec   : > { %v826_v0 = vpop.f32.mrf.mxu0 }
 0x2ee   : > { %v1363_v30 = vpop.f32.mrf.mxu0 }
 0x2f0   : > { %v829_v23 = vpop.f32.mrf.mxu0 }
 0x2f2   : > { %v1366_v31 = vpop.f32.mrf.mxu0 }
 0x2f3   : > { %v902_v44 = vmul.f32 %v1471_v20, %v1366_v31 }
 0x2f4   : > { %v842_v43 = vpop.f32.mrf.mxu0 }
 0x2f5   : > { %v919_v27 = vsub.f32 %v1856_v8, %v902_v44  ;;  %v898_v7 = vmul.f32 %v1477_v46, %v842_v43  ;;  %v1479_v8 = vpop.eup %1478 }
 0x2f6   : > { %v1367_v55 = vpop.f32.mrf.mxu0  ;;  %v1481_v16 = vpop.eup %1480 }
 0x2f7   : > { %v904_v6 = vmul.f32 %v1473_v38, %v1367_v55  ;;  %v935_v4 = vand.u32 2147483647, %v919_v27  ;;  %v917_v51 = vsub.f32 %v1863_v37, %v898_v7  ;;  %v1483_v3 = vpop.eup %1482 }
 0x2f8   : > { %v845_v61 = vpop.f32.mrf.mxu0  ;;  %v892_v40 = vmul.f32 %v1483_v3, %v829_v23 }
 0x2f9   : > { %v920_v49 = vsub.f32 %v1870_v15, %v904_v6  ;;  %v900_v22 = vmul.f32 %v1475_v32, %v845_v61  ;;  %v896_v15 = vmul.f32 %v1479_v8, %v1363_v30  ;;  %v933_v35 = vand.u32 2147483647, %v917_v51 }
 0x2fa   : > { %v914_v9 = vsub.f32 %v1849_v18, %v892_v40 }
 0x2fb   : > { %v936_v48 = vand.u32 2147483647, %v920_v49  ;;  %v918_v25 = vsub.f32 %v1876_v19, %v900_v22  ;;  %v894_v19 = vmul.f32 %v1481_v16, %v1362_v13  ;;  %v916_v63 = vsub.f32 %v1842_v2, %v896_v15  ;;  %v1485_v13 = vpop.eup %1484 }
 0x2fc   : > { %v890_v30 = vmul.f32 %v1485_v13, %v826_v0  ;;  %v1487_v41 = vpop.eup %1486  ;;  %v930_v31 = vand.u32 2147483647, %v914_v9  ;;  %v1058_v49 = vlaneseq }
 0x2fd   : > { %1369 = vmatpush3.xpose.msk.msra.mxu1 %vm341_vm0, %v936_v48  ;;  %v934_v58 = vand.u32 2147483647, %v918_v25  ;;  %v915_v37 = vsub.f32 %v1828_v50, %v894_v19  ;;  %v932_v60 = vand.u32 2147483647, %v916_v63  ;;  %v888_v50 = vmul.f32 %v1487_v41, %v1924_v14  ;;  %v1489_v43 = vpop.eup %1488 }
 0x2fe   : > { %1370 = vmatprep.subr.mxu1 %v1502_v57  ;;  %v913_v23 = vsub.f32 %v1835_v52, %v890_v30  ;;  %v886_v0 = vmul.f32 %v1489_v43, %v1918_v53  ;;  %v1491_v26 = vpop.eup %1490  ;;  %v1059_v59 = vand.u32 127, %v1058_v49 }
 0x2ff   : > { %v931_v2 = vand.u32 2147483647, %v915_v37  ;;  %v912_v18 = vsub.f32 %v1814_v39, %v888_v50  ;;  %v884_v52 = vmul.f32 %v1491_v26, %v1926_v56  ;;  %v1493_v55 = vpop.eup %1492  ;;  %v908_v56 = vsub.f32 %v1790_v47, %v1914_v36 }
 0x300   : > { %v929_v20 = vand.u32 2147483647, %v913_v23  ;;  %v911_v14 = vsub.f32 %v1801_v5, %v886_v0  ;;  %v882_v53 = vmul.f32 %v1493_v55, %v1921_v1  ;;  %v905_v47 = vsub.f32 %v1785_v29, %v1912_v34 }
 0x301   : > { %1371 = vmatpush3.xpose.msk.msra.mxu1 %vm341_vm0, %v935_v4  ;;  %v928_v38 = vand.u32 2147483647, %v912_v18  ;;  %v910_v39 = vsub.f32 %v1821_v45, %v884_v52  ;;  %v907_v45 = vsub.f32 %v1780_v28, %v1910_v12  ;;  %v924_v1 = vand.u32 2147483647, %v908_v56 }
 0x302   : > { %1372 = vmatprep.subr.mxu1 %v1502_v57  ;;  %v927_v44 = vand.u32 2147483647, %v911_v14  ;;  %v909_v6 = vsub.f32 %v1808_v11, %v882_v53  ;;  %v922_v36 = vand.u32 2147483647, %v906_v42  ;;  %v921_v28 = vand.u32 2147483647, %v905_v47 }
 0x303   : > { %v926_v5 = vand.u32 2147483647, %v910_v39  ;;  %v923_v11 = vand.u32 2147483647, %v907_v45  ;;  %v1504_v12 = vmov 1.0   ;;  %vm1060_vm2 = vcmp.lt.s32.totalorder %v1059_v59, 111 }
 0x304   : > { %v925_v61 = vand.u32 2147483647, %v909_v6 }
 0x305   : > { %1373 = vmatpush3.xpose.msk.msra.mxu1 %vm341_vm0, %v934_v58 }
 0x306   : > { %1374 = vmatprep.subr.mxu1 %v1502_v57 }
 0x309   : > { %1375 = vmatpush3.xpose.msk.msra.mxu1 %vm341_vm0, %v933_v35 }
 0x30a   : > { %1376 = vmatprep.subr.mxu1 %v1502_v57 }
 0x30d   : > { %1377 = vmatpush3.xpose.msk.msra.mxu1 %vm341_vm0, %v932_v60 }
 0x30e   : > { %1378 = vmatprep.subr.mxu1 %v1502_v57 }
 0x311   : > { %1379 = vmatpush3.xpose.msk.msra.mxu1 %vm341_vm0, %v931_v2 }
 0x312   : > { %1380 = vmatprep.subr.mxu1 %v1502_v57 }
 0x315   : > { %1381 = vmatpush3.xpose.msk.msra.mxu1 %vm341_vm0, %v930_v31 }
 0x316   : > { %1382 = vmatprep.subr.mxu1 %v1502_v57 }
 0x319   : > { %1383 = vmatpush3.xpose.msk.msra.mxu1 %vm341_vm0, %v929_v20 }
 0x31a   : > { %1384 = vmatprep.subr.mxu1 %v1502_v57 }
 0x31d   : > { %1385 = vmatpush3.xpose.msk.msra.mxu1 %vm341_vm0, %v928_v38 }
 0x31e   : > { %1386 = vmatprep.subr.mxu1 %v1502_v57 }
 0x321   : > { %1387 = vmatpush3.xpose.msk.msra.mxu1 %vm341_vm0, %v927_v44 }
 0x322   : > { %1388 = vmatprep.subr.mxu1 %v1502_v57 }
 0x325   : > { %1389 = vmatpush3.xpose.msk.msra.mxu1 %vm341_vm0, %v926_v5 }
 0x326   : > { %1390 = vmatprep.subr.mxu1 %v1502_v57 }
 0x329   : > { %1391 = vmatpush3.xpose.msk.msra.mxu1 %vm341_vm0, %v925_v61 }
 0x32a   : > { %1392 = vmatprep.subr.mxu1 %v1502_v57 }
 0x32d   : > { %1393 = vmatpush3.xpose.msk.msra.mxu1 %vm341_vm0, %v924_v1 }
 0x32e   : > { %1394 = vmatprep.subr.mxu1 %v1502_v57 }
 0x331   : > { %1395 = vmatpush3.xpose.msk.msra.mxu1 %vm341_vm0, %v923_v11 }
 0x332   : > { %1396 = vmatprep.subr.mxu1 %v1502_v57 }
 0x335   : > { %1397 = vmatpush3.xpose.msk.msra.mxu1 %vm341_vm0, %v922_v36 }
 0x336   : > { %1398 = vmatprep.subr.mxu1 %v1502_v57 }
 0x339   : > { %1399 = vmatpush3.xpose.msk.msra.mxu1 %vm341_vm0, %v921_v28 }
 0x33c   : > { %1401 = vmatmul.mubr.msk.f32.vlgmr.msra.gmra.mxu1 %vm341_vm0, %v1504_v12 }
 0x3fc   : > { %v1054_v62 = vpop.f32.mrf.mxu1 }
 0x3fd   : > { %v1061_v29 = vsel %vm1060_vm2, %v1054_v62, -1e+30 }
 0x3fe   : > { %1062 = vst [vmem:[%s226_s6] sm:$0x1] %v1061_v29  ;;  %v1402_v34 = vpop.f32.mrf.mxu1 }
 0x3ff PF: > { %s15_s15 = sadd.s32 1, %s1500_s15  }
 0x400   : > { %p12_p4 = scmp.ge.s32.totalorder %s15_s15, 4  }
 0x402   :  { %14 = sbr.rel (!%p12_p4) target bundleno = 1 (0x1), region = 77 }

// kernel: mybraingnn_forward.4
= control target key start
LH: loop header
LB: loop body
LE: loop exit
PB: predicated region body
PF: predicated region fallthrough
CT: control target
= control target key end

     0   :  { %s1092_s15 = smov 0   ;;  %s1296_s0 = inlined_call_operand.vmem [shape: bf16[2,64,64], index: 0, kind: input, shape index: {}]   ;;  %s1297_s1 = inlined_call_operand.vmem [shape: f32[2,64,8], index: 1, kind: input, shape index: {}]   ;;  %s1298_s2 = inlined_call_operand.vmem [shape: f32[8,8], index: 2, kind: input, shape index: {}]   ;;  %s1299_s3 = inlined_call_operand.vmem [shape: f32[2,64,8], index: 3, kind: output, shape index: {0}]   ;;  %s1300_s4 = inlined_call_operand.vmem [shape: f32[2,1,64], index: 4, kind: output, shape index: {1}]  }
   0x1 LB: > { %s861_s16 = sadd.s32 4294967295, %s1062_s15   ;;  %p865_p0 = scmp.ge.s32.totalorder %s1062_s15, 1  ;;  %s1062_s15 = sphi %s1092_s15, %s15_s15  }
   0x2   : > { %p175_p1 = scmp.lt.s32.totalorder %s1062_s15, 3 }
   0x4   : > { %p176_p2 = pnand %p865_p0, %p175_p1 }
   0x5   : > { %p209_p3 = scmp.lt.s32.totalorder (!%p176_p2), %s861_s16, 1 }
   0x6   : > { %179 = sbr.rel (%p176_p2) target bundleno = 909 (0x38d), region = 32 }
   0xb   : > { %v293_v0 = vld [vmem:[%s1298_s2] sm:$0xff]  ;;  %s1302_s16 = smov (!%p209_p3, %s861_s16), 1  ;;  %vm294_vm0 = vcmask 64512   ;;  %vm252_vm1 = vcmask 523264   ;;  %vm1065_vm2 = vmmov 0   ;;  %vm767_vm4 = vcmask 516096  }
   0xc   : > { %940 = vmatprep.subr.mxu1 %v293_v0  ;;  %s904_s19 = sshll.u32 %s1302_s16, 6  ;;  %s903_s20 = sshll.u32 %s1302_s16, 5 }
   0xd   : > { %941 = vmatpush3.msra.mxu1 %v293_v0  ;;  %s1112_s23 = scalar_lea.vmem %s1297_s1, %s904_s19  ;;  %s213_s26 = scalar_lea.vmem %s1296_s0, %s903_s20 }
   0xe   : > { %v236_v1 = vld [vmem:[%s1112_s23] sm:$0xff]  ;;  %v237_v2 = vld [vmem:[%s1112_s23 + $0x8] sm:$0xff]  ;;  %v238_v3 = vld [vmem:[%s1112_s23 + $0x10] sm:$0xff]  ;;  %s1202_s29 = scalar_lea.vmem %s1299_s3, %s904_s19  ;;  %s226_s6 = scalar_lea.vmem %s1300_s4, %s1302_s16 }
   0xf   : > { %942 = vmatprep.mubr.msk.f32.mxu1 %vm294_vm0, %v236_v1  ;;  %v1122_v4 = vld [vmem:[%s213_s26 + $0x10] sm:$0xff]   ;;  %v239_v5 = vld [vmem:[%s1112_s23 + $0x18] sm:$0xff]  ;;  %v240_v9 = vld [vmem:[%s1112_s23 + $0x20] sm:$0xff] }
  0x10   : > { %943 = vmatmul.mubr.msk.f32.vlgmr.msra.gmra.mxu1 %vm294_vm0, %v237_v2  ;;  %v248_v6 = vunpack.c.l.bf16 %v1122_v4  ;;  %v1127_v7 = vld [vmem:[%s213_s26 + $0x18] sm:$0xff]   ;;  %v249_v8 = vunpack.c.h.bf16 %v1122_v4  ;;  %v1133_v12 = vld [vmem:[%s213_s26 + $0x8] sm:$0xff]   ;;  %v242_v18 = vld [vmem:[%s1112_s23 + $0x30] sm:$0xff] }
  0x11   : > { %945 = vmatprep.mubr.msk.f32.mxu1 %vm294_vm0, %v238_v3  ;;  %v250_v10 = vunpack.c.l.bf16 %v1127_v7  ;;  %v251_v11 = vunpack.c.h.bf16 %v1127_v7  ;;  %v241_v15 = vld [vmem:[%s1112_s23 + $0x28] sm:$0xff]  ;;  %v247_v17 = vunpack.c.h.bf16 %v1133_v12  ;;  %v246_v20 = vunpack.c.l.bf16 %v1133_v12  ;;  %v1145_v21 = vld [vmem:[%s213_s26] sm:$0xff]   ;;  %v243_v22 = vld [vmem:[%s1112_s23 + $0x38] sm:$0xff] }
  0x12   : > { %v265_v13 = vsel %vm252_vm1, %v248_v6, 0.0  ;;  %v268_v16 = vsel %vm252_vm1, %v249_v8, 0.0  ;;  %v245_v24 = vunpack.c.h.bf16 %v1145_v21  ;;  %v244_v26 = vunpack.c.l.bf16 %v1145_v21  ;;  %962 = vmatprep.mubr.msk.bf16.mxu0 %vm252_vm1, %v1145_v21 }
  0x13   : > { %266 = vadd.xlane.f32.xlu1 %v265_v13  ;;  %v271_v14 = vsel %vm252_vm1, %v250_v10, 0.0  ;;  %v274_v19 = vsel %vm252_vm1, %v251_v11, 0.0  ;;  %v262_v23 = vsel %vm252_vm1, %v247_v17, 0.0  ;;  %v259_v25 = vsel %vm252_vm1, %v246_v20, 0.0 }
  0x14   : > { %946 = vmatmul.mubr.msk.f32.gmra.mxu1 %vm294_vm0, %v239_v5  ;;  %272 = vadd.xlane.f32.xlu0 %v271_v14  ;;  %v256_v27 = vsel %vm252_vm1, %v245_v24, 0.0  ;;  %v253_v28 = vsel %vm252_vm1, %v244_v26, 0.0 }
  0x15   : > { %948 = vmatprep.mubr.msk.f32.mxu1 %vm294_vm0, %v240_v9 }
  0x17   : > { %269 = vadd.xlane.f32.xlu1 %v268_v16 }
  0x18   : > { %949 = vmatmul.mubr.msk.f32.gmra.mxu1 %vm294_vm0, %v241_v15  ;;  %275 = vadd.xlane.f32.xlu0 %v274_v19 }
  0x19   : > { %951 = vmatprep.mubr.msk.f32.mxu1 %vm294_vm0, %v242_v18 }
  0x1b   : > { %263 = vadd.xlane.f32.xlu1 %v262_v23 }
  0x1c   : > { %952 = vmatmul.mubr.msk.f32.gmra.mxu1 %vm294_vm0, %v243_v22  ;;  %260 = vadd.xlane.f32.xlu0 %v259_v25 }
  0x1f   : > { %257 = vadd.xlane.f32.xlu1 %v256_v27 }
  0x20   : > { %254 = vadd.xlane.f32.xlu0 %v253_v28 }
  0x9c   : > { %v1161_v30 = vpop.xlane.xlu1 %266 }
  0x9d   : > { %v1159_v29 = vpop.xlane.xlu0 %272  ;;  %v281_v33 = vadd.f32 1.0, %v1161_v30 }
  0x9e   : > { %v283_v36 = vadd.f32 1.0, %v1159_v29 }
  0x9f   : > { %1024 = vrsqrt.f32 %v281_v33 }
  0xa0   : > { %v1165_v32 = vpop.xlane.xlu1 %269 }
  0xa1   : > { %v1163_v31 = vpop.xlane.xlu0 %275  ;;  %v282_v38 = vadd.f32 1.0, %v1165_v32 }
  0xa2   : > { %v284_v35 = vadd.f32 1.0, %v1163_v31 }
  0xa4   : > { %v1172_v37 = vpop.xlane.xlu1 %263  ;;  %1026 = vrsqrt.f32 %v284_v35 }
  0xa5   : > { %v1168_v34 = vpop.xlane.xlu0 %260  ;;  %1028 = vrsqrt.f32 %v283_v36  ;;  %v280_v42 = vadd.f32 1.0, %v1172_v37 }
  0xa6   : > { %v279_v39 = vadd.f32 1.0, %v1168_v34  ;;  %1030 = vrsqrt.f32 %v282_v38 }
  0xa8   : > { %v1179_v43 = vpop.xlane.xlu1 %257  ;;  %1032 = vrsqrt.f32 %v279_v39 }
  0xa9   : > { %v1176_v40 = vpop.xlane.xlu0 %254  ;;  %1034 = vrsqrt.f32 %v280_v42  ;;  %v278_v47 = vadd.f32 1.0, %v1179_v43 }
  0xaa   : > { %v277_v45 = vadd.f32 1.0, %v1176_v40 }
  0xac   : > { %1036 = vrsqrt.f32 %v277_v45  ;;  %v1025_v51 = vpop.eup %1024 }
  0xad   : > { %1038 = vrsqrt.f32 %v278_v47 }
  0xb1   : > { %v1183_v52 = vpop.eup %1026 }
  0xb2   : > { %v1029_v54 = vpop.eup %1028 }
  0xb3   : > { %v1185_v55 = vpop.eup %1030 }
  0xb5   : > { %v1033_v60 = vpop.eup %1032 }
  0xb6   : > { %v1035_v63 = vpop.eup %1034 }
  0xb9   : > { %v1037_v2 = vpop.eup %1036 }
  0xba   : > { %v1039_v5 = vpop.eup %1038 }
  0xd0   : > { %v944_v41 = vpop.f32.mrf.mxu1 }
  0xd1   : > { %v425_v9 = vmul.f32 %v1039_v5, %v944_v41 }
  0xd2   : > { %v385_v44 = vpop.f32.mrf.mxu1 }
  0xd3   : > { %v424_v6 = vmul.f32 %v1037_v2, %v385_v44 }
  0xd4   : > { %v947_v46 = vpop.f32.mrf.mxu1 }
  0xd5   : > { %v427_v3 = vmul.f32 %v1035_v63, %v947_v46  ;;  %v432_v10 = vpack.c.bf16 %v425_v9, %v424_v6 }
  0xd6   : > { %v395_v48 = vpop.f32.mrf.mxu1 }
  0xd7   : > { %v426_v0 = vmul.f32 %v1033_v60, %v395_v48 }
  0xd8   : > { %v950_v49 = vpop.f32.mrf.mxu1 }
  0xd9   : > { %v429_v61 = vmul.f32 %v1185_v55, %v950_v49  ;;  %v433_v8 = vpack.c.bf16 %v427_v3, %v426_v0 }
  0xda   : > { %v405_v50 = vpop.f32.mrf.mxu1 }
  0xdb   : > { %v428_v57 = vmul.f32 %v1025_v51, %v405_v50 }
  0xdc   : > { %v953_v53 = vpop.f32.mrf.mxu1 }
  0xdd   : > { %v431_v58 = vmul.f32 %v1183_v52, %v953_v53  ;;  %v434_v1 = vpack.c.bf16 %v429_v61, %v428_v57 }
  0xde   : > { %v415_v56 = vpop.f32.mrf.mxu1 }
  0xdf   : > { %v430_v59 = vmul.f32 %v1029_v54, %v415_v56  ;;  %v1064_v56 = vmov 0.0  }
  0xe0   : > { %986 = vmatprep.subr.mxu1 %v1064_v56  ;;  %1002 = vmatprep.mubr.msk.f32.mxu1 %vm1065_vm2, %v1064_v56 }
  0xe1   : > { %v435_v62 = vpack.c.bf16 %v431_v58, %v430_v59 }
  0xe3   : > { %954 = vmatprep.subr.bf16.mxu0 %v435_v62 }
  0xe4   : > { %955 = vmatpush3.bf16.msra.mxu0 %v435_v62  ;;  %v629_v62 = vmax.f32 %v1172_v37, 1.0 }
  0xe5   : > { %956 = vmatprep.subr.bf16.mxu0 %v434_v1 }
  0xe8   : > { %957 = vmatpush3.bf16.msra.mxu0 %v434_v1 }
  0xe9   : > { %958 = vmatprep.subr.bf16.mxu0 %v433_v8 }
  0xec   : > { %959 = vmatpush3.bf16.msra.mxu0 %v433_v8 }
  0xed   : > { %960 = vmatprep.subr.bf16.mxu0 %v432_v10 }
  0xf0   : > { %961 = vmatpush3.bf16.msra.mxu0 %v432_v10 }
  0xf3   : > { %963 = vmatmul.mubr.msk.bf16.vlgmr.msra.gmra.mxu0 %vm252_vm1, %v1133_v12 }
  0xf4   : > { %966 = vmatprep.mubr.msk.bf16.mxu0 %vm252_vm1, %v1122_v4 }
  0xfb   : > { %967 = vmatmul.mubr.msk.bf16.gmra.mxu0 %vm252_vm1, %v1127_v7 }
  0xfc   : > { %978 = vmatprep.mubr.msk.bf16.mxu0 %vm252_vm1, %v1145_v21 }
 0x1b3   : > { %v964_v11 = vpop.f32.mrf.mxu0 }
 0x1b4   : > { %v511_v13 = vadd.f32 %v964_v11, %v426_v0  ;;  %v626_v11 = vmax.f32 %v1176_v40, 1.0 }
 0x1b5   : > { %v502_v14 = vpop.f32.mrf.mxu0 }
 0x1b6   : > { %v535_v15 = vmul.f32 %v1033_v60, %v511_v13  ;;  %v503_v16 = vadd.f32 %v502_v14, %v424_v6 }
 0x1b7   : > { %v965_v17 = vpop.f32.mrf.mxu0 }
 0x1b8   : > { %v1204_v18 = vmax.f32 %v535_v15, 0.0  ;;  %v533_v19 = vmul.f32 %v1037_v2, %v503_v16  ;;  %v514_v20 = vadd.f32 %v965_v17, %v427_v3 }
 0x1b9   : > { %v505_v21 = vpop.f32.mrf.mxu0 }
 0x1ba   : > { %551 = vst.msk [vmem:[%s1202_s29 + $0x10] sm:$0xff] %vm294_vm0, %v1204_v18  ;;  %v1209_v22 = vmax.f32 %v533_v19, 0.0  ;;  %v536_v23 = vmul.f32 %v1035_v63, %v514_v20  ;;  %v506_v24 = vadd.f32 %v505_v21, %v425_v9 }
 0x1bb   : > { %v968_v25 = vpop.f32.mrf.mxu0 }
 0x1bc   : > { %549 = vst.msk [vmem:[%s1202_s29] sm:$0xff] %vm294_vm0, %v1209_v22  ;;  %v1214_v26 = vmax.f32 %v536_v23, 0.0  ;;  %v534_v27 = vmul.f32 %v1039_v5, %v506_v24  ;;  %v527_v28 = vadd.f32 %v968_v25, %v430_v59  ;;  %v631_v59 = vmax.f32 %v1165_v32, 1.0 }
 0x1bd   : > { %v518_v33 = vpop.f32.mrf.mxu0 }
 0x1be   : > { %552 = vst.msk [vmem:[%s1202_s29 + $0x18] sm:$0xff] %vm294_vm0, %v1214_v26  ;;  %v1219_v35 = vmax.f32 %v534_v27, 0.0  ;;  %v539_v36 = vmul.f32 %v1029_v54, %v527_v28  ;;  %v519_v38 = vadd.f32 %v518_v33, %v428_v57  ;;  %v558_v54 = vpack.c.bf16 %v1214_v26, %v1204_v18 }
 0x1bf   : > { %v969_v39 = vpop.f32.mrf.mxu0  ;;  %v632_v57 = vmax.f32 %v1159_v29, 1.0  ;;  %v628_v29 = vmax.f32 %v1168_v34, 1.0 }
 0x1c0   : > { %550 = vst.msk [vmem:[%s1202_s29 + $0x8] sm:$0xff] %vm294_vm0, %v1219_v35  ;;  %v1224_v41 = vmax.f32 %v539_v36, 0.0  ;;  %v537_v42 = vmul.f32 %v1025_v51, %v519_v38  ;;  %v530_v44 = vadd.f32 %v969_v39, %v431_v58  ;;  %v633_v58 = vmax.f32 %v1163_v31, 1.0 }
 0x1c1   : > { %v521_v45 = vpop.f32.mrf.mxu0  ;;  %1040 = vrcp.f32 %v632_v57 }
 0x1c2   : > { %555 = vst.msk [vmem:[%s1202_s29 + $0x30] sm:$0xff] %vm294_vm0, %v1224_v41  ;;  %v1229_v46 = vmax.f32 %v537_v42, 0.0  ;;  %v540_v47 = vmul.f32 %v1183_v52, %v530_v44  ;;  %v522_v48 = vadd.f32 %v521_v45, %v429_v61  ;;  %1042 = vrcp.f32 %v633_v58 }
 0x1c3   : > { %1044 = vrcp.f32 %v631_v59  ;;  %v1066_v42 = vmov 1.0   ;;  %v763_v44 = vlaneseq }
 0x1c4   : > { %553 = vst.msk [vmem:[%s1202_s29 + $0x20] sm:$0xff] %vm294_vm0, %v1229_v46  ;;  %v548_v49 = vmax.f32 %v540_v47, 0.0  ;;  %v538_v50 = vmul.f32 %v1185_v55, %v522_v48  ;;  %v557_v55 = vpack.c.bf16 %v1219_v35, %v1209_v22 }
 0x1c5   : > { %v764_v45 = vand.u32 127, %v763_v44 }
 0x1c6   : > { %556 = vst.msk [vmem:[%s1202_s29 + $0x38] sm:$0xff] %vm294_vm0, %v548_v49  ;;  %v1238_v53 = vmax.f32 %v538_v50, 0.0  ;;  %v560_v51 = vpack.c.bf16 %v548_v49, %v1224_v41 }
 0x1c7   : > { %vm765_vm3 = vcmp.lt.s32.totalorder %v764_v45, 56 }
 0x1c8   : > { %554 = vst.msk [vmem:[%s1202_s29 + $0x28] sm:$0xff] %vm294_vm0, %v1238_v53  ;;  %970 = vmatprep.subr.bf16.mxu0 %v560_v51  ;;  %v559_v52 = vpack.c.bf16 %v1238_v53, %v1229_v46 }
 0x1c9   : > { %971 = vmatpush3.bf16.msra.mxu0 %v560_v51 }
 0x1ca   : > { %972 = vmatprep.subr.bf16.mxu0 %v559_v52 }
 0x1cd   : > { %973 = vmatpush3.bf16.msra.mxu0 %v559_v52 }
 0x1ce   : > { %974 = vmatprep.subr.bf16.mxu0 %v558_v54  ;;  %v1041_v1 = vpop.eup %1040 }
 0x1cf   : > { %v1043_v31 = vpop.eup %1042 }
 0x1d0   : > { %v1045_v8 = vpop.eup %1044 }
 0x1d1   : > { %975 = vmatpush3.bf16.msra.mxu0 %v558_v54 }
 0x1d2   : > { %976 = vmatprep.subr.bf16.mxu0 %v557_v55 }
 0x1d5   : > { %977 = vmatpush3.bf16.msra.mxu0 %v557_v55 }
 0x1d8   : > { %979 = vmatmul.mubr.msk.bf16.vlgmr.msra.gmra.mxu0 %vm252_vm1, %v1133_v12 }
 0x1d9   : > { %982 = vmatprep.mubr.msk.bf16.mxu0 %vm252_vm1, %v1122_v4  ;;  %v630_v4 = vmax.f32 %v1161_v30, 1.0  ;;  %v627_v30 = vmax.f32 %v1179_v43, 1.0 }
 0x1db   : > { %1046 = vrcp.f32 %v630_v4 }
 0x1dc   : > { %1048 = vrcp.f32 %v629_v62 }
 0x1dd   : > { %1050 = vrcp.f32 %v628_v29 }
 0x1de   : > { %1052 = vrcp.f32 %v627_v30 }
 0x1df   : > { %1054 = vrcp.f32 %v626_v11 }
 0x1e0   : > { %983 = vmatmul.mubr.msk.bf16.gmra.mxu0 %vm252_vm1, %v1127_v7 }
 0x1e8   : > { %v1047_v34 = vpop.eup %1046 }
 0x1e9   : > { %v1049_v43 = vpop.eup %1048 }
 0x1ea   : > { %v1051_v40 = vpop.eup %1050 }
 0x1eb   : > { %v1053_v24 = vpop.eup %1052 }
 0x1ec   : > { %v1055_v33 = vpop.eup %1054 }
 0x298   : > { %v980_v12 = vpop.f32.mrf.mxu0 }
 0x299   : > { %v639_v20 = vmul.f32 %v1051_v40, %v980_v12 }
 0x29a   : > { %v595_v60 = vpop.f32.mrf.mxu0 }
 0x29b   : > { %v652_v25 = vsub.f32 %v1204_v18, %v639_v20  ;;  %v635_v38 = vmul.f32 %v1055_v33, %v595_v60 }
 0x29c   : > { %v981_v7 = vpop.f32.mrf.mxu0 }
 0x29d   : > { %v641_v16 = vmul.f32 %v1049_v43, %v981_v7  ;;  %v660_v36 = vand.u32 2147483647, %v652_v25  ;;  %v650_v39 = vsub.f32 %v1209_v22, %v635_v38 }
 0x29e   : > { %v598_v61 = vpop.f32.mrf.mxu0 }
 0x29f   : > { %v653_v21 = vsub.f32 %v1214_v26, %v641_v16  ;;  %v637_v28 = vmul.f32 %v1053_v24, %v598_v61  ;;  %v658_v18 = vand.u32 2147483647, %v650_v39 }
 0x2a0   : > { %v984_v63 = vpop.f32.mrf.mxu0 }
 0x2a1   : > { %v647_v32 = vmul.f32 %v1041_v1, %v984_v63  ;;  %v661_v27 = vand.u32 2147483647, %v653_v21  ;;  %v651_v26 = vsub.f32 %v1219_v35, %v637_v28 }
 0x2a2   : > { %v611_v0 = vpop.f32.mrf.mxu0 }
 0x2a3   : > { %v656_v9 = vsub.f32 %v1224_v41, %v647_v32  ;;  %v643_v14 = vmul.f32 %v1047_v34, %v611_v0  ;;  %v659_v41 = vand.u32 2147483647, %v651_v26 }
 0x2a4   : > { %v985_v2 = vpop.f32.mrf.mxu0 }
 0x2a5   : > { %v649_v3 = vmul.f32 %v1043_v31, %v985_v2  ;;  %v664_v13 = vand.u32 2147483647, %v656_v9  ;;  %v654_v17 = vsub.f32 %v1229_v46, %v643_v14 }
 0x2a6   : > { %v614_v5 = vpop.f32.mrf.mxu0 }
 0x2a7   : > { %v657_v6 = vsub.f32 %v548_v49, %v649_v3  ;;  %v645_v37 = vmul.f32 %v1045_v8, %v614_v5  ;;  %v662_v23 = vand.u32 2147483647, %v654_v17 }
 0x2a9   : > { %v665_v10 = vand.u32 2147483647, %v657_v6  ;;  %v655_v15 = vsub.f32 %v1238_v53, %v645_v37 }
 0x2ab   : > { %987 = vmatpush3.xpose.msk.msra.mxu1 %vm294_vm0, %v665_v10  ;;  %v663_v19 = vand.u32 2147483647, %v655_v15 }
 0x2ac   : > { %988 = vmatprep.subr.mxu1 %v1064_v56 }
 0x2af   : > { %989 = vmatpush3.xpose.msk.msra.mxu1 %vm294_vm0, %v664_v13 }
 0x2b0   : > { %990 = vmatprep.subr.mxu1 %v1064_v56 }
 0x2b3   : > { %991 = vmatpush3.xpose.msk.msra.mxu1 %vm294_vm0, %v663_v19 }
 0x2b4   : > { %992 = vmatprep.subr.mxu1 %v1064_v56 }
 0x2b7   : > { %993 = vmatpush3.xpose.msk.msra.mxu1 %vm294_vm0, %v662_v23 }
 0x2b8   : > { %994 = vmatprep.subr.mxu1 %v1064_v56 }
 0x2bb   : > { %995 = vmatpush3.xpose.msk.msra.mxu1 %vm294_vm0, %v661_v27 }
 0x2bc   : > { %996 = vmatprep.subr.mxu1 %v1064_v56 }
 0x2bf   : > { %997 = vmatpush3.xpose.msk.msra.mxu1 %vm294_vm0, %v660_v36 }
 0x2c0   : > { %998 = vmatprep.subr.mxu1 %v1064_v56 }
 0x2c3   : > { %999 = vmatpush3.xpose.msk.msra.mxu1 %vm294_vm0, %v659_v41 }
 0x2c4   : > { %1000 = vmatprep.subr.mxu1 %v1064_v56 }
 0x2c7   : > { %1001 = vmatpush3.xpose.msk.msra.mxu1 %vm294_vm0, %v658_v18 }
 0x2ca   : > { %1003 = vmatmul.mubr.msk.f32.vlgmr.msra.gmra.mxu1 %vm294_vm0, %v1066_v42 }
 0x38a   : > { %v759_v22 = vpop.f32.mrf.mxu1 }
 0x38b   : > { %v766_v35 = vsel %vm765_vm3, %v759_v22, -1e+30 }
 0x38c   : > { %768 = vst.msk [vmem:[%s226_s6] sm:$0x1] %vm767_vm4, %v766_v35  ;;  %v1004_v46 = vpop.f32.mrf.mxu1 }
 0x38d PF: > { %s15_s15 = sadd.s32 1, %s1062_s15  }
 0x38e   : > { %p12_p4 = scmp.ge.s32.totalorder %s15_s15, 4  }
 0x390   :  { %14 = sbr.rel (!%p12_p4) target bundleno = 1 (0x1), region = 77 }

// kernel: mybraingnn_forward.5
= control target key start
LH: loop header
LB: loop body
LE: loop exit
PB: predicated region body
PF: predicated region fallthrough
CT: control target
= control target key end

     0   :  { %v694_v3 = vmov 0.0   ;;  %vm695_vm0 = vmmov 0   ;;  %v696_v6 = vmov 1983009808   ;;  %v332_v8 = vlaneseq  ;;  %s1080_s3 = inlined_call_operand.vmem [shape: f32[256,16], index: 3, kind: input, shape index: {}]   ;;  %s1081_s4 = inlined_call_operand.vmem [shape: f32[8,16], index: 4, kind: input, shape index: {}]   ;;  %s1082_s2 = inlined_call_operand.vmem [shape: f32[2,256], index: 2, kind: input, shape index: {}]   ;;  %s1083_s0 = inlined_call_operand.vmem [shape: f32[2,64,8], index: 0, kind: input, shape index: {}]   ;;  %s1084_s1 = inlined_call_operand.vmem [shape: f32[2,32,8], index: 1, kind: input, shape index: {}]   ;;  %s1085_s5 = inlined_call_operand.vmem [shape: f32[8,16], index: 5, kind: input, shape index: {}]   ;;  %s1086_s9 = inlined_call_operand.vmem [shape: f32[16,1], index: 9, kind: input, shape index: {}]   ;;  %s1087_s10 = inlined_call_operand.<no memory space> [shape: f32[1,1], index: 10, kind: input, shape index: {}]   ;;  %s1088_s6 = inlined_call_operand.vmem [shape: f32[1,16], index: 6, kind: input, shape index: {}]   ;;  %s1089_s7 = inlined_call_operand.vmem [shape: f32[1,16], index: 7, kind: input, shape index: {}]   ;;  %s1090_s8 = inlined_call_operand.vmem [shape: f32[1,16], index: 8, kind: input, shape index: {}]   ;;  %s1091_s11 = inlined_call_operand.vmem [shape: f32[2,1], index: 11, kind: output, shape index: {}]  }
   0x1   :  { %v250_v0 = vld [vmem:[%s1080_s3 + $0xf8] sm:$0xff]  ;;  %v249_v2 = vld [vmem:[%s1080_s3 + $0xf0] sm:$0xff]  ;;  %672 = vmatprep.subr.mxu0 %v694_v3  ;;  %674 = vmatprep.mubr.msk.f32.mxu0 %vm695_vm0, %v694_v3  ;;  %v248_v5 = vld [vmem:[%s1080_s3 + $0xe8] sm:$0xff]  ;;  %v330_v7 = vunpack.c.l.s4 %v696_v6  ;;  %vm64_vm1 = vcmask 64512   ;;  %vm254_vm2 = vcmask 1041409   ;;  %vm495_vm3 = vcmask 123904  }
   0x2   :  { %v234_v1 = vld [vmem:[%s1080_s3 + $0x78] sm:$0xff]  ;;  %632 = vmatprep.subr.mxu1 %v250_v0  ;;  %v233_v4 = vld [vmem:[%s1080_s3 + $0x70] sm:$0xff]  ;;  %v232_v9 = vld [vmem:[%s1080_s3 + $0x68] sm:$0xff]  ;;  %v333_v14 = vshrl.u32 %v332_v8, 7  ;;  %vm543_vm4 = vcmask 130048   ;;  %vm617_vm5 = vcmask 1024  }
   0x3   :  { %633 = vmatpush3.msra.mxu1 %v234_v1  ;;  %v247_v10 = vld [vmem:[%s1080_s3 + $0xe0] sm:$0xff]  ;;  %v246_v12 = vld [vmem:[%s1080_s3 + $0xd8] sm:$0xff]  ;;  %v331_v13 = vunpack.c.0.s8 %v330_v7  ;;  %v245_v16 = vld [vmem:[%s1080_s3 + $0xd0] sm:$0xff] }
   0x4   :  { %634 = vmatprep.subr.mxu1 %v249_v2  ;;  %v231_v11 = vld [vmem:[%s1080_s3 + $0x60] sm:$0xff]  ;;  %v230_v15 = vld [vmem:[%s1080_s3 + $0x58] sm:$0xff]  ;;  %v229_v17 = vld [vmem:[%s1080_s3 + $0x50] sm:$0xff] }
   0x5   :  { %635 = vmatpush3.msra.mxu1 %v233_v4  ;;  %v244_v18 = vld [vmem:[%s1080_s3 + $0xc8] sm:$0xff]  ;;  %v243_v20 = vld [vmem:[%s1080_s3 + $0xc0] sm:$0xff]  ;;  %v334_v22 = vsub.s32 %v331_v13, %v333_v14  ;;  %v242_v27 = vld [vmem:[%s1080_s3 + $0xb8] sm:$0xff] }
   0x6   :  { %636 = vmatprep.subr.mxu1 %v248_v5  ;;  %v228_v19 = vld [vmem:[%s1080_s3 + $0x48] sm:$0xff]  ;;  %v251_v21 = vld [vmem:[%s1081_s4] sm:$0xff]  ;;  %v42_v29 = vld [vmem:[%s1083_s0 + $0x10] sm:$0xff] }
   0x7   :  { %637 = vmatpush3.msra.mxu1 %v232_v9  ;;  %v227_v23 = vld [vmem:[%s1080_s3 + $0x40] sm:$0xff]  ;;  %673 = vmatpush3.msra.mxu0 %v251_v21  ;;  %v820_v26 = vld [vmem:[%s1083_s0 + $0x8] sm:$0xff]  ;;  %v831_v30 = vld [vmem:[%s1083_s0 + $0x18] sm:$0xff]  ;;  %v67_v38 = vsel %vm64_vm1, %v42_v29, -inf }
   0x8   :  { %638 = vmatprep.subr.mxu1 %v247_v10  ;;  %v217_v24 = vld [vmem:[%s1082_s2] sm:$0xf]  ;;  %v66_v33 = vsel %vm64_vm1, %v820_v26, -inf  ;;  %677 = vmatprep.subr.mxu0 %v694_v3  ;;  %v226_v34 = vld [vmem:[%s1080_s3 + $0x38] sm:$0xff]  ;;  %v848_v35 = vld [vmem:[%s1083_s0 + $0x28] sm:$0xff]  ;;  %v69_v39 = vsel %vm64_vm1, %v831_v30, -inf }
   0x9   :  { %639 = vmatpush3.msra.mxu1 %v231_v11  ;;  %v40_v25 = vld [vmem:[%s1083_s0] sm:$0xff]  ;;  %v218_v28 = vmax.f32 %v217_v24, 0.0  ;;  %v853_v36 = vld [vmem:[%s1083_s0 + $0x30] sm:$0xff]  ;;  %v858_v37 = vld [vmem:[%s1083_s0 + $0x38] sm:$0xff]  ;;  %v70_v46 = vmax.f32 %v66_v33, %v69_v39  ;;  %v73_v47 = vsel %vm64_vm1, %v848_v35, -inf }
   0xa   :  { %640 = vmatprep.subr.mxu1 %v246_v12  ;;  %v836_v31 = vld [vmem:[%s1083_s0 + $0x20] sm:$0xff]  ;;  %v65_v32 = vsel %vm64_vm1, %v40_v25, -inf  ;;  %v241_v41 = vld [vmem:[%s1080_s3 + $0xb0] sm:$0xff]  ;;  %v49_v44 = vld [vmem:[%s1083_s0 + $0x48] sm:$0xff]  ;;  %v75_v51 = vsel %vm64_vm1, %v853_v36, -inf  ;;  %v77_v52 = vsel %vm64_vm1, %v858_v37, -inf }
   0xb   :  { %641 = vmatpush3.msra.mxu1 %v230_v15  ;;  %v71_v40 = vsel %vm64_vm1, %v836_v31, -inf  ;;  %v868_v42 = vrot.slane %v218_v28, %v334_v22  ;;  %v48_v43 = vld [vmem:[%s1083_s0 + $0x40] sm:$0xff]  ;;  %v68_v45 = vmax.f32 %v65_v32, %v67_v38  ;;  %v881_v48 = vld [vmem:[%s1083_s0 + $0x58] sm:$0xff]  ;;  %v891_v50 = vld [vmem:[%s1083_s0 + $0x68] sm:$0xff]  ;;  %v74_v59 = vmax.f32 %v70_v46, %v73_v47 }
   0xc   :  { %642 = vmatprep.subr.mxu1 %v245_v16  ;;  %v886_v49 = vld [vmem:[%s1083_s0 + $0x60] sm:$0xff]  ;;  %v86_v53 = vsel %vm64_vm1, %v48_v43, -inf  ;;  %v50_v55 = vld [vmem:[%s1083_s0 + $0x50] sm:$0xff]  ;;  %v911_v57 = vld [vmem:[%s1083_s0 + $0x78] sm:$0xff]  ;;  %v87_v60 = vsel %vm64_vm1, %v49_v44, -inf  ;;  %v90_v63 = vsel %vm64_vm1, %v881_v48, -inf }
   0xd   :  { %643 = vmatpush3.msra.mxu1 %v229_v17  ;;  %v336_v54 = vcombine.high %v868_v42, %v868_v42  ;;  %v906_v56 = vld [vmem:[%s1083_s0 + $0x70] sm:$0xff]  ;;  %v72_v58 = vmax.f32 %v68_v45, %v71_v40  ;;  %v88_v62 = vsel %vm64_vm1, %v50_v55, -inf  ;;  %v92_v0 = vsel %vm64_vm1, %v886_v49, -inf  ;;  %v240_v1 = vld [vmem:[%s1080_s3 + $0xa8] sm:$0xff]  ;;  %v239_v12 = vld [vmem:[%s1080_s3 + $0xa0] sm:$0xff] }
   0xe   :  { %644 = vmatprep.subr.mxu1 %v244_v18  ;;  %v225_v61 = vld [vmem:[%s1080_s3 + $0x30] sm:$0xff]  ;;  %v78_v4 = vmax.f32 %v74_v59, %v77_v52  ;;  %v89_v5 = vmax.f32 %v86_v53, %v88_v62  ;;  %v94_v6 = vsel %vm64_vm1, %v891_v50, -inf  ;;  %v224_v7 = vld [vmem:[%s1080_s3 + $0x28] sm:$0xff]  ;;  %v91_v8 = vmax.f32 %v87_v60, %v90_v63  ;;  %v223_v17 = vld [vmem:[%s1080_s3 + $0x20] sm:$0xff] }
   0xf   :  { %645 = vmatpush3.msra.mxu1 %v228_v19  ;;  %403 = vmatprep.mubr.f32.mxu1 %v336_v54  ;;  %v76_v2 = vmax.f32 %v72_v58, %v75_v51  ;;  %v96_v9 = vsel %vm64_vm1, %v906_v56, -inf  ;;  %v98_v10 = vsel %vm64_vm1, %v911_v57, -inf  ;;  %v107_v11 = vsel %vm64_vm1, %v40_v25, 0.0  ;;  %v222_v25 = vld [vmem:[%s1080_s3 + $0x18] sm:$0xff]  ;;  %v58_v33 = vld [vmem:[%s1084_s1 + $0x10] sm:$0xff]  ;;  %v220_v51 = vld [vmem:[%s1080_s3 + $0x8] sm:$0xff] }
  0x10   :  { %646 = vmatprep.subr.mxu1 %v243_v20  ;;  %v93_v14 = vmax.f32 %v89_v5, %v92_v0  ;;  %v108_v15 = vsel %vm64_vm1, %v820_v26, 0.0  ;;  %v110_v16 = vsel %vm64_vm1, %v42_v29, 0.0  ;;  %v95_v18 = vmax.f32 %v91_v8, %v94_v6  ;;  %v238_v20 = vld [vmem:[%s1080_s3 + $0x98] sm:$0xff]  ;;  %v56_v26 = vld [vmem:[%s1084_s1] sm:$0xff]  ;;  %v61_v53 = vld [vmem:[%s1084_s1 + $0x28] sm:$0xff] }
  0x11   :  { %647 = vmatpush3.msra.mxu1 %v227_v23  ;;  %v79_v13 = vmax.f32 %v76_v2, %v78_v4  ;;  %v109_v19 = vadd.f32 %v108_v15, %v107_v11  ;;  %v112_v23 = vsel %vm64_vm1, %v831_v30, 0.0  ;;  %v114_v24 = vsel %vm64_vm1, %v836_v31, 0.0  ;;  %v237_v30 = vld [vmem:[%s1080_s3 + $0x90] sm:$0xff]  ;;  %v57_v31 = vld [vmem:[%s1084_s1 + $0x8] sm:$0xff]  ;;  %v60_v52 = vld [vmem:[%s1084_s1 + $0x20] sm:$0xff] }
  0x12   :  { %648 = vmatprep.subr.mxu1 %v242_v27  ;;  %v97_v22 = vmax.f32 %v93_v14, %v96_v9  ;;  %v99_v27 = vmax.f32 %v95_v18, %v98_v10  ;;  %v128_v29 = vsel %vm64_vm1, %v48_v43, 0.0  ;;  %v129_v32 = vsel %vm64_vm1, %v49_v44, 0.0  ;;  %v236_v43 = vld [vmem:[%s1080_s3 + $0x88] sm:$0xff]  ;;  %v982_v44 = vld [vmem:[%s1084_s1 + $0x18] sm:$0xff]  ;;  %v62_v58 = vld [vmem:[%s1084_s1 + $0x30] sm:$0xff] }
  0x13   :  { %649 = vmatpush3.msra.mxu1 %v226_v34  ;;  %v80_v21 = vrot.slane %v79_v13, 4  ;;  %v111_v28 = vadd.f32 %v110_v16, %v109_v19  ;;  %v970_v38 = vsel %vm64_vm1, %v848_v35, 0.0  ;;  %v130_v39 = vadd.f32 %v129_v32, %v128_v29  ;;  %v1008_v59 = vld [vmem:[%s1084_s1 + $0x38] sm:$0xff]  ;;  %v235_v63 = vld [vmem:[%s1080_s3 + $0x80] sm:$0xff] }
  0x14   :  { %650 = vmatprep.subr.mxu1 %v241_v41  ;;  %v131_v40 = vsel %vm64_vm1, %v50_v55, 0.0  ;;  %v221_v41 = vld [vmem:[%s1080_s3 + $0x10] sm:$0xff]  ;;  %v100_v45 = vmax.f32 %v97_v22, %v99_v27  ;;  %v986_v46 = vsel %vm64_vm1, %v853_v36, 0.0  ;;  %v133_v47 = vsel %vm64_vm1, %v881_v48, 0.0 }
  0x15   :  { %651 = vmatpush3.msra.mxu1 %v225_v61  ;;  %v81_v34 = vmax.f32 %v79_v13, %v80_v21  ;;  %v113_v35 = vadd.f32 %v112_v23, %v111_v28  ;;  %v132_v55 = vadd.f32 %v131_v40, %v130_v39  ;;  %v135_v36 = vsel %vm64_vm1, %v886_v49, 0.0 }
  0x16   :  { %652 = vmatprep.subr.mxu1 %v240_v1  ;;  %v151_v48 = vsel %vm64_vm1, %v56_v26, -inf  ;;  %v101_v60 = vrot.slane %v100_v45, 4  ;;  %v137_v61 = vsel %vm64_vm1, %v891_v50, 0.0  ;;  %v152_v62 = vsel %vm64_vm1, %v57_v31, -inf  ;;  %v219_v50 = vld [vmem:[%s1080_s3] sm:$0xff] }
  0x17   :  { %653 = vmatpush3.msra.mxu1 %v224_v7  ;;  %v82_v54 = vrot.slane %v81_v34, 2  ;;  %v153_v49 = vsel %vm64_vm1, %v58_v33, -inf  ;;  %v134_v1 = vadd.f32 %v133_v47, %v132_v55  ;;  %v155_v4 = vsel %vm64_vm1, %v982_v44, -inf }
  0x18   :  { %654 = vmatprep.subr.mxu1 %v239_v12  ;;  %v154_v2 = vmax.f32 %v151_v48, %v153_v49  ;;  %v102_v5 = vmax.f32 %v100_v45, %v101_v60  ;;  %v156_v6 = vmax.f32 %v152_v62, %v155_v4  ;;  %v164_v7 = vsel %vm64_vm1, %v60_v52, -inf }
  0x19   :  { %655 = vmatpush3.msra.mxu1 %v223_v17  ;;  %v83_v0 = vmax.f32 %v81_v34, %v82_v54  ;;  %v165_v8 = vsel %vm64_vm1, %v61_v53, -inf  ;;  %v139_v10 = vsel %vm64_vm1, %v906_v56, 0.0  ;;  %v166_v11 = vsel %vm64_vm1, %v62_v58, -inf }
  0x1a   :  { %656 = vmatprep.subr.mxu1 %v238_v20  ;;  %v168_v12 = vsel %vm64_vm1, %v1008_v59, -inf  ;;  %v103_v13 = vrot.slane %v102_v5, 2  ;;  %v157_v14 = vmax.f32 %v154_v2, %v156_v6  ;;  %v167_v15 = vmax.f32 %v164_v7, %v166_v11 }
  0x1b   :  { %657 = vmatpush3.msra.mxu1 %v222_v25  ;;  %v84_v9 = vrot.slane %v83_v0, 1  ;;  %v169_v16 = vmax.f32 %v165_v8, %v168_v12  ;;  %v115_v17 = vadd.f32 %v114_v24, %v113_v35  ;;  %v136_v18 = vadd.f32 %v135_v36, %v134_v1 }
  0x1c   :  { %658 = vmatprep.subr.mxu1 %v237_v30  ;;  %v177_v19 = vsel %vm64_vm1, %v56_v26, 0.0  ;;  %v178_v20 = vsel %vm64_vm1, %v57_v31, 0.0  ;;  %v104_v21 = vmax.f32 %v102_v5, %v103_v13  ;;  %v158_v22 = vrot.slane %v157_v14, 4 }
  0x1d   :  { %659 = vmatpush3.msra.mxu1 %v221_v41  ;;  %v170_v56 = vmax.f32 %v167_v15, %v169_v16  ;;  %v179_v23 = vadd.f32 %v178_v20, %v177_v19  ;;  %v85_v25 = vmax.f32 %v83_v0, %v84_v9  ;;  %v180_v27 = vsel %vm64_vm1, %v58_v33, 0.0 }
  0x1e   :  { %660 = vmatprep.subr.mxu1 %v236_v43  ;;  %v190_v28 = vsel %vm64_vm1, %v60_v52, 0.0  ;;  %v191_v29 = vsel %vm64_vm1, %v61_v53, 0.0  ;;  %v159_v32 = vmax.f32 %v157_v14, %v158_v22  ;;  %v193_v26 = vsel %vm64_vm1, %v62_v58, 0.0 }
  0x1f   :  { %661 = vmatpush3.msra.mxu1 %v220_v51  ;;  %v171_v24 = vrot.slane %v170_v56, 4  ;;  %v192_v30 = vadd.f32 %v191_v29, %v190_v28  ;;  %v105_v34 = vrot.slane %v104_v21, 1  ;;  %v117_v31 = vadd.f32 %v970_v38, %v115_v17 }
  0x20   :  { %662 = vmatprep.subr.mxu1 %v235_v63  ;;  %v120_v39 = vsel %vm64_vm1, %v858_v37, 0.0  ;;  %v138_v40 = vadd.f32 %v137_v61, %v136_v18  ;;  %v141_v33 = vsel %vm64_vm1, %v911_v57, 0.0  ;;  %v181_v43 = vadd.f32 %v180_v27, %v179_v23  ;;  %v409_v18 = vld [vmem:[%s1085_s5] sm:$0xff] }
  0x21   :  { %663 = vmatpush3.msra.mxu1 %v219_v50  ;;  %v172_v41 = vmax.f32 %v170_v56, %v171_v24  ;;  %v119_v45 = vadd.f32 %v986_v46, %v117_v31  ;;  %v182_v47 = vsel %vm64_vm1, %v982_v44, 0.0  ;;  %v194_v51 = vadd.f32 %v193_v26, %v192_v30 }
  0x22   :  { %404 = vmatmul.mubr.f32.vlgmr.msra.gmra.mxu1 %v868_v42  ;;  %v160_v42 = vrot.slane %v159_v32, 2  ;;  %v140_v35 = vadd.f32 %v139_v10, %v138_v40  ;;  %v183_v38 = vadd.f32 %v182_v47, %v181_v43  ;;  %v106_v54 = vmax.f32 %v104_v21, %v105_v34 }
  0x23   :  { %v173_v53 = vrot.slane %v172_v41, 2  ;;  %v121_v55 = vadd.f32 %v120_v39, %v119_v45  ;;  %v195_v36 = vsel %vm64_vm1, %v1008_v59, 0.0  ;;  %v205_v61 = vmax.f32 %v85_v25, 0.0 }
  0x24   :  { %v161_v52 = vmax.f32 %v159_v32, %v160_v42  ;;  %v142_v37 = vadd.f32 %v141_v33, %v140_v35  ;;  %v184_v57 = vrot.slane %v183_v38, 4  ;;  %v196_v60 = vadd.f32 %v195_v36, %v194_v51  ;;  %v534_v33 = vld [vmem:[%s1086_s9] sm:$0xff] }
  0x25   :  { %v174_v58 = vmax.f32 %v172_v41, %v173_v53  ;;  %v122_v46 = vrot.slane %v121_v55, 4  ;;  %v206_v1 = vmax.f32 %v106_v54, 0.0  ;;  %v535_v41 = vld [vmem:[%s1086_s9 + $0x8] sm:$0xff]  ;;  %v16_v43 = vstv %s1087_s10  ;;  %v625_v54 = vld [vmem:[%s1088_s6] ss:$0 sm:$0xff] }
  0x26   :  { %v162_v48 = vrot.slane %v161_v52, 1  ;;  %v143_v62 = vrot.slane %v142_v37, 4  ;;  %v185_v44 = vadd.f32 %v184_v57, %v183_v38  ;;  %v197_v0 = vrot.slane %v196_v60, 4  ;;  %17 = vst [vmem:[#allocation2] sm:$0x1] %v16_v43 }
  0x27   :  { %v175_v63 = vrot.slane %v174_v58, 1  ;;  %v123_v2 = vadd.f32 %v122_v46, %v121_v55 }
  0x28   :  { %v163_v49 = vmax.f32 %v161_v52, %v162_v48  ;;  %v144_v4 = vadd.f32 %v143_v62, %v142_v37  ;;  %v186_v6 = vrot.slane %v185_v44, 2  ;;  %v198_v7 = vadd.f32 %v197_v0, %v196_v60 }
  0x29   :  { %v176_v50 = vmax.f32 %v174_v58, %v175_v63  ;;  %v124_v8 = vrot.slane %v123_v2, 2 }
  0x2a   :  { %v207_v5 = vmax.f32 %v163_v49, 0.0  ;;  %v145_v59 = vrot.slane %v144_v4, 2  ;;  %v187_v11 = vadd.f32 %v186_v6, %v185_v44  ;;  %v199_v12 = vrot.slane %v198_v7, 2 }
  0x2b   :  { %v208_v9 = vmax.f32 %v176_v50, 0.0  ;;  %v125_v13 = vadd.f32 %v124_v8, %v123_v2 }
  0x2c   :  { %v209_v10 = vadd.f32 %v207_v5, %v205_v61  ;;  %v146_v14 = vadd.f32 %v145_v59, %v144_v4  ;;  %v188_v16 = vrot.slane %v187_v11, 1  ;;  %v200_v17 = vadd.f32 %v199_v12, %v198_v7 }
  0x2d   :  { %v210_v15 = vadd.f32 %v208_v9, %v206_v1  ;;  %v126_v19 = vrot.slane %v125_v13, 1  ;;  %v626_v9 = vld [vmem:[%s1089_s7] ss:$0 sm:$0xff] }
  0x2e   :  { %v147_v20 = vrot.slane %v146_v14, 1  ;;  %v189_v22 = vadd.f32 %v188_v16, %v187_v11  ;;  %v201_v56 = vrot.slane %v200_v17, 1  ;;  %v627_v11 = vld [vmem:[%s1090_s8] ss:$0 sm:$0xff] }
  0x2f   :  { %v255_v21 = vsel %vm254_vm2, %v210_v15, %v209_v10  ;;  %v127_v23 = vadd.f32 %v126_v19, %v125_v13 }
  0x30   :  { %675 = vmatmul.mubr.msk.f32.vlgmr.msra.gmra.mxu0 %vm64_vm1, %v255_v21  ;;  %v148_v25 = vadd.f32 %v147_v20, %v146_v14  ;;  %v202_v27 = vadd.f32 %v201_v56, %v200_v17  ;;  %v203_v28 = vmul.f32 0.035714287, %v189_v22  ;;  %v628_v14 = vld [vmem:[#allocation2] ss:$0 sm:$0xff] }
  0x31   :  { %678 = vmatpush3.msra.mxu0 %v409_v18  ;;  %679 = vmatprep.mubr.msk.f32.mxu0 %vm695_vm0, %v694_v3  ;;  %v149_v29 = vmul.f32 0.017857144, %v127_v23 }
  0x32   :  { %v150_v32 = vmul.f32 0.017857144, %v148_v25  ;;  %682 = vmatprep.subr.mxu0 %v694_v3  ;;  %v204_v24 = vmul.f32 0.035714287, %v202_v27  ;;  %v213_v30 = vmax.f32 %v203_v28, 0.0 }
  0x33   :  { %v211_v26 = vmax.f32 %v149_v29, 0.0 }
  0x34   :  { %v212_v34 = vmax.f32 %v150_v32, 0.0  ;;  %v214_v31 = vmax.f32 %v204_v24, 0.0 }
  0x35   :  { %v215_v39 = vadd.f32 %v213_v30, %v211_v26 }
  0x36   :  { %v216_v40 = vadd.f32 %v214_v31, %v212_v34 }
  0x38   :  { %v412_v42 = vsel %vm254_vm2, %v216_v40, %v215_v39 }
  0x39   :  { %680 = vmatmul.mubr.msk.f32.vlgmr.msra.gmra.mxu0 %vm64_vm1, %v412_v42 }
  0x3a   :  { %686 = vmatprep.mubr.msk.f32.mxu0 %vm695_vm0, %v694_v3  ;;  %683 = vmatpush3.msra.mxu0 %v535_v41 }
  0x3b   :  { %684 = vmatprep.subr.mxu0 %v694_v3 }
  0x3c   :  { %685 = vmatpush3.msra.mxu0 %v534_v33 }
  0xe2   :  { %v664_v45 = vpop.f32.mrf.mxu1 }
  0xe4   :  { %v665_v47 = vpop.f32.mrf.mxu1 }
  0xe5   :  { %v666_v52 = vadd.f32 %v665_v47, %v664_v45 }
  0xf0   :  { %v324_v35 = vpop.f32.mrf.mxu0 }
  0xf1   :  { %v406_v53 = vadd.f32 %v666_v52, %v324_v35 }
  0xf2   :  { %v676_v51 = vpop.f32.mrf.mxu0 }
  0xf9   :  { %v481_v38 = vpop.f32.mrf.mxu0 }
  0xfa   :  { %v485_v55 = vadd.f32 %v481_v38, %v406_v53 }
  0xfb   :  { %v681_v37 = vpop.f32.mrf.mxu0 }
  0xfc   :  { %v493_v3 = vadd.f32 %v625_v54, %v485_v55 }
  0xfe   :  { %v494_v36 = vmax.f32 %v493_v3, 0.0 }
 0x100   :  { %v496_v48 = vsel %vm495_vm3, %v494_v36, 0.0 }
 0x101   :  { %v497_v58 = vrot.slane %v496_v48, 4 }
 0x103   :  { %v498_v57 = vadd.f32 %v497_v58, %v496_v48 }
 0x105   :  { %v499_v60 = vrot.slane %v498_v57, 2 }
 0x107   :  { %v500_v61 = vadd.f32 %v499_v60, %v498_v57 }
 0x109   :  { %v501_v46 = vrot.slane %v500_v61, 1 }
 0x10b   :  { %v502_v62 = vadd.f32 %v501_v46, %v500_v61 }
 0x10d   :  { %v504_v49 = vmul.f32 0.5, %v502_v62 }
 0x10f   :  { %v505_v63 = vsub.f32 %v494_v36, %v504_v49 }
 0x111   :  { %v506_v44 = vmul.f32 %v505_v63, %v505_v63 }
 0x113   :  { %v507_v0 = vsel %vm495_vm3, %v506_v44, 0.0 }
 0x114   :  { %v508_v1 = vrot.slane %v507_v0, 4 }
 0x116   :  { %v509_v2 = vadd.f32 %v508_v1, %v507_v0 }
 0x118   :  { %v510_v4 = vrot.slane %v509_v2, 2 }
 0x11a   :  { %v511_v50 = vadd.f32 %v510_v4, %v509_v2 }
 0x11c   :  { %v512_v5 = vrot.slane %v511_v50, 1 }
 0x11e   :  { %v513_v6 = vadd.f32 %v512_v5, %v511_v50 }
 0x120   :  { %v514_v7 = vmul.f32 0.5, %v513_v6 }
 0x122   :  { %v515_v8 = vadd.f32 1e-05, %v514_v7 }
 0x124   :  { %692 = vrsqrt.f32 %v515_v8 }
 0x131   :  { %v693_v59 = vpop.eup %692 }
 0x132   :  { %v517_v10 = vmul.f32 %v693_v59, %v505_v63 }
 0x134   :  { %v525_v12 = vmul.f32 %v626_v9, %v517_v10 }
 0x136   :  { %v533_v13 = vadd.f32 %v627_v11, %v525_v12 }
 0x138   :  { %687 = vmatmul.mubr.msk.f32.vlgmr.msra.gmra.mxu0 %vm543_vm4, %v533_v13 }
 0x1f8   :  { %v613_v15 = vpop.f32.mrf.mxu0 }
 0x1f9   :  { %v614_v16 = vadd.f32 %v628_v14, %v613_v15 }
 0x1fa   :  { %v688_v17 = vpop.f32.mrf.mxu0 }
 0x1fb   :  { %618 = vst.msk [vmem:[%s1091_s11] sm:$0x3] %vm617_vm5, %v614_v16 }

</bundles_post_ra>
